<compile_context>
chip_gen: v7x
topology: tpu7x:2x2x1
jax: 0.10.0
libtpu: 0.0.40
codegen_flags: <defaults>
</compile_context>

<pallas_src>
import functools

import jax
import jax.numpy as jnp
from jax.experimental import pallas as pl
from jax.experimental.pallas import tpu as pltpu


def _round_up(x, m):
    return ((x + m - 1) // m) * m


def skipgram_kernel(ids_ref, table_ref, wt_ref, b_ref, out_ref, emb_ref, *,
                    tn, compute_dtype):
    """Computes one (tn, tv) logits tile.

    ids_ref:   (n_pad,) int32  SMEM (scalar prefetch)   flattened token ids
    table_ref: (V, D)   f32    VMEM, resident           embedding table
    wt_ref:    (D, tv)  bf16   VMEM, streamed over j    linear weight (pre-transposed)
    b_ref:     (1, tv)  f32    VMEM, streamed over j    linear bias tile
    out_ref:   (tn, tv) f32                             logits tile
    emb_ref:   (tn, D)  f32    scratch, persists across the j (vocab) axis
    """
    i = pl.program_id(0)          # token-tile index
    j = pl.program_id(1)          # vocab-tile index
    base = i * tn

    # Gather this token tile's embeddings only once per i (j == 0); the scratch
    # persists while all vocab tiles for the same i are streamed.
    @pl.when(j == 0)
    def _gather():
        # Fully unrolled, 8 rows per batch -> static, 8-aligned (8, D) stores
        # instead of per-row masked single-sublane stores with dynamic offsets.
        for g in range(tn // 8):
            rows = [
                table_ref[pl.ds(ids_ref[base + g * 8 + k], 1), :]
                for k in range(8)
            ]
            emb_ref[g * 8:(g + 1) * 8, :] = jnp.concatenate(rows, axis=0)
    # TODO(synk): gather-ahead double buffering (emb scratch (2, tn, D)) would
    # hide the j==0 gather under the previous tile's matmul as well.

    # MXU matmul: bf16 x bf16 -> f32 accumulation.  The (tn, D) cast is
    # negligible next to the (tn, tv, D) matmul.
    emb = emb_ref[...].astype(compute_dtype)                      # (tn, D)
    logits = jnp.dot(emb, wt_ref[...],
                     preferred_element_type=jnp.float32)          # (tn, tv)
    out_ref[...] = (logits + b_ref[...]).astype(out_ref.dtype)


def skipgram_forward(x, table, weight, bias, *, tile_n=256, tile_v=512,
                     compute_dtype=jnp.bfloat16):
    """x: (B, S) int ids; table: (V, D); weight: (V, D) torch layout; bias: (V,).

    Note: like nn.Embedding(padding_idx=1), the forward pass is a plain row
    lookup; the padding row is only special at init / in the backward pass, so
    the caller's table is used as-is.
    """
    B, S = x.shape
    V, D = table.shape
    N = B * S

    # Token-axis tile: multiple of 16 (bf16 sublane packing), capped at tile_n.
    tn = _round_up(min(tile_n, _round_up(N, 16)), 16)
    n_pad = _round_up(N, tn)
    # Vocab-axis tile: multiple of 128 (lane-dense output), capped at tile_v.
    tv = _round_up(min(tile_v, _round_up(V, 128)), 128)
    v_pad = _round_up(V, tv)

    # Ids: flatten, clamp (no unchecked OOB VMEM reads in the kernel), pad.
    ids = jnp.clip(x.reshape(N).astype(jnp.int32), 0, V - 1)
    if n_pad != N:
        ids = jnp.concatenate([ids, jnp.zeros((n_pad - N,), jnp.int32)])

    # One-time layout / dtype prep (amortized over the whole kernel):
    # weight -> (D, v_pad) bf16: standard MXU contraction (no per-step
    # transpose) and half the streamed HBM/VMEM bytes.
    table_f32 = table.astype(jnp.float32)
    w_t = weight.T.astype(compute_dtype)
    b2 = bias.reshape(1, V).astype(jnp.float32)
    if v_pad != V:
        w_t = jnp.pad(w_t, ((0, 0), (0, v_pad - V)))
        b2 = jnp.pad(b2, ((0, 0), (0, v_pad - V)))

    cbytes = jnp.dtype(compute_dtype).itemsize
    # Explicit scoped-VMEM budget: resident table (double-buffered by the
    # default pipeline), streamed weight/bias/out tiles (double-buffered),
    # plus the emb scratch.
    # TODO(synk): pipeline_mode=pl.Buffered(1) on the resident table spec would
    # drop its second buffer (V*D*4 bytes) once validated on target jax versions.
    vmem_bytes = (2 * V * D * 4            # embedding table (f32, 2 buffers)
                  + 2 * D * tv * cbytes    # weight tiles
                  + 2 * tv * 4             # bias tiles
                  + 2 * tn * tv * 4        # output tiles
                  + tn * D * 4)            # emb scratch
    vmem_limit = int(min(max(int(vmem_bytes * 1.5) + (2 << 20), 16 << 20),
                         96 << 20))

    grid = (n_pad // tn, v_pad // tv)
    grid_spec = pltpu.PrefetchScalarGridSpec(
        num_scalar_prefetch=1,
        grid=grid,
        in_specs=[
            pl.BlockSpec((V, D), lambda i, j, ids: (0, 0)),    # table (resident)
            pl.BlockSpec((D, tv), lambda i, j, ids: (0, j)),   # weight^T tiles
            pl.BlockSpec((1, tv), lambda i, j, ids: (0, j)),   # bias tiles
        ],
        out_specs=pl.BlockSpec((tn, tv), lambda i, j, ids: (i, j)),
        scratch_shapes=[pltpu.VMEM((tn, D), jnp.float32)],
    )

    cost = pl.CostEstimate(
        flops=int(2 * n_pad * D * v_pad),
        transcendentals=0,
        bytes_accessed=int(n_pad * v_pad * 4             # logits writeback
                           + grid[0] * D * v_pad * cbytes  # streamed weights
                           + V * D * 4                    # table cold load
                           + n_pad * 4),                  # token ids
    )

    out = pl.pallas_call(
        functools.partial(skipgram_kernel, tn=tn, compute_dtype=compute_dtype),
        out_shape=jax.ShapeDtypeStruct((n_pad, v_pad), jnp.float32),
        grid_spec=grid_spec,
        compiler_params=pltpu.CompilerParams(
            dimension_semantics=("parallel", "arbitrary"),
            vmem_limit_bytes=vmem_limit),
        cost_estimate=cost,
    )(ids, table_f32, w_t, b2)

    # TODO(synk): for HBM-write-bound cases emit bf16 logits (or fuse the
    # downstream loss); kept f32 here to match the PyTorch module's output dtype.
    return out[:N, :V].reshape(B, S, V)


def reference_forward(x, table, weight, bias, compute_dtype=jnp.bfloat16):
    """Same math (bf16 operands, f32 accumulation) in plain JAX."""
    B, S = x.shape
    V, D = table.shape
    emb = jnp.take(table, x.reshape(-1), axis=0).astype(compute_dtype)  # (N, D)
    w_t = weight.T.astype(compute_dtype)                                # (D, V)
    logits = jnp.dot(emb, w_t, preferred_element_type=jnp.float32) + bias
    return logits.reshape(B, S, V)


if __name__ == "__main__":
    vocab_size = 512
    embedding_dim = 128
    batch, seq = 4, 32

    key = jax.random.PRNGKey(0)
    k_emb, k_w, k_b, k_x = jax.random.split(key, 4)

    # nn.Embedding init: N(0,1), padding_idx=1 row zeroed at init.
    table = jax.random.normal(k_emb, (vocab_size, embedding_dim), jnp.float32)
    table = table.at[1].set(0.0)

    # nn.Linear init: U(-1/sqrt(D), 1/sqrt(D)) for weight and bias.
    bound = 1.0 / (embedding_dim ** 0.5)
    weight = jax.random.uniform(k_w, (vocab_size, embedding_dim), jnp.float32,
                                minval=-bound, maxval=bound)
    bias = jax.random.uniform(k_b, (vocab_size,), jnp.float32,
                              minval=-bound, maxval=bound)

    x = jax.random.randint(k_x, (batch, seq), 0, vocab_size, dtype=jnp.int32)

    # tile_n=64 / tile_v=256 -> grid (2, 2): exercises the parallel token axis
    # and the streamed vocab axis even at these small demo shapes.
    out = skipgram_forward(x, table, weight, bias, tile_n=64, tile_v=256)
    out = jax.block_until_ready(out)

    ref = reference_forward(x, table, weight, bias)
    assert out.shape == (batch, seq, vocab_size)
    assert jnp.allclose(out, ref, atol=2e-3, rtol=2e-3), (
        "mismatch vs reference: max abs diff "
        f"{float(jnp.max(jnp.abs(out - ref)))}")

    print("KERNEL_OK")
</pallas_src>

<mosaic_0001>
module attributes {stable_mosaic.version = 11 : i64} {
  func.func @skipgram_kernel(%arg0: i32, %arg1: i32, %arg2: memref<128xi32, #tpu.memory_space<smem>>, %arg3: memref<512x128xf32, #tpu.memory_space<vmem>>, %arg4: memref<128x256xbf16, #tpu.memory_space<vmem>>, %arg5: memref<1x256xf32, #tpu.memory_space<vmem>>, %arg6: memref<64x256xf32, #tpu.memory_space<vmem>>, %arg7: memref<64x128xf32, #tpu.memory_space<vmem>>) attributes {dimension_semantics = [#tpu.dimension_semantics<parallel>, #tpu.dimension_semantics<arbitrary>], iteration_bounds = array<i64: 2, 2>, scalar_prefetch = 1 : i64, scratch_operands = 1 : i64, tpu.core_type = #tpu.core_type<tc>, window_params = [{pipeline_mode = #tpu.pipeline_mode<synchronous>, transform_indices = @transform_0, window_bounds = array<i64: 512, 128>}, {transform_indices = @transform_1, window_bounds = array<i64: 128, 256>}, {transform_indices = @transform_2, window_bounds = array<i64: 1, 256>}, {transform_indices = @transform_3, window_bounds = array<i64: 64, 256>}]} {
    %c64_i32 = arith.constant 64 : i32
    %0 = arith.muli %arg0, %c64_i32 : i32
    %c0_i32 = arith.constant 0 : i32
    %1 = arith.cmpi eq, %arg1, %c0_i32 : i32
    %2 = arith.extui %1 : i1 to i32
    %c0_i32_0 = arith.constant 0 : i32
    %3 = arith.cmpi ne, %2, %c0_i32_0 : i32
    scf.if %3 {
      %c0_i32_8 = arith.constant 0 : i32
      %12 = arith.addi %0, %c0_i32_8 : i32
      %c0_i32_9 = arith.constant 0 : i32
      %13 = arith.addi %12, %c0_i32_9 : i32
      %14 = arith.index_cast %13 : i32 to index
      %15 = memref.load %arg2[%14] : memref<128xi32, #tpu.memory_space<smem>>
      %16 = arith.index_cast %15 : i32 to index
      %c0_10 = arith.constant 0 : index
      %17 = vector.load %arg3[%16, %c0_10] : memref<512x128xf32, #tpu.memory_space<vmem>>, vector<1x128xf32>
      %c0_i32_11 = arith.constant 0 : i32
      %18 = arith.addi %0, %c0_i32_11 : i32
      %c1_i32 = arith.constant 1 : i32
      %19 = arith.addi %18, %c1_i32 : i32
      %20 = arith.index_cast %19 : i32 to index
      %21 = memref.load %arg2[%20] : memref<128xi32, #tpu.memory_space<smem>>
      %22 = arith.index_cast %21 : i32 to index
      %c0_12 = arith.constant 0 : index
      %23 = vector.load %arg3[%22, %c0_12] : memref<512x128xf32, #tpu.memory_space<vmem>>, vector<1x128xf32>
      %c0_i32_13 = arith.constant 0 : i32
      %24 = arith.addi %0, %c0_i32_13 : i32
      %c2_i32 = arith.constant 2 : i32
      %25 = arith.addi %24, %c2_i32 : i32
      %26 = arith.index_cast %25 : i32 to index
      %27 = memref.load %arg2[%26] : memref<128xi32, #tpu.memory_space<smem>>
      %28 = arith.index_cast %27 : i32 to index
      %c0_14 = arith.constant 0 : index
      %29 = vector.load %arg3[%28, %c0_14] : memref<512x128xf32, #tpu.memory_space<vmem>>, vector<1x128xf32>
      %c0_i32_15 = arith.constant 0 : i32
      %30 = arith.addi %0, %c0_i32_15 : i32
      %c3_i32 = arith.constant 3 : i32
      %31 = arith.addi %30, %c3_i32 : i32
      %32 = arith.index_cast %31 : i32 to index
      %33 = memref.load %arg2[%32] : memref<128xi32, #tpu.memory_space<smem>>
      %34 = arith.index_cast %33 : i32 to index
      %c0_16 = arith.constant 0 : index
      %35 = vector.load %arg3[%34, %c0_16] : memref<512x128xf32, #tpu.memory_space<vmem>>, vector<1x128xf32>
      %c0_i32_17 = arith.constant 0 : i32
      %36 = arith.addi %0, %c0_i32_17 : i32
      %c4_i32 = arith.constant 4 : i32
      %37 = arith.addi %36, %c4_i32 : i32
      %38 = arith.index_cast %37 : i32 to index
      %39 = memref.load %arg2[%38] : memref<128xi32, #tpu.memory_space<smem>>
      %40 = arith.index_cast %39 : i32 to index
      %c0_18 = arith.constant 0 : index
      %41 = vector.load %arg3[%40, %c0_18] : memref<512x128xf32, #tpu.memory_space<vmem>>, vector<1x128xf32>
      %c0_i32_19 = arith.constant 0 : i32
      %42 = arith.addi %0, %c0_i32_19 : i32
      %c5_i32 = arith.constant 5 : i32
      %43 = arith.addi %42, %c5_i32 : i32
      %44 = arith.index_cast %43 : i32 to index
      %45 = memref.load %arg2[%44] : memref<128xi32, #tpu.memory_space<smem>>
      %46 = arith.index_cast %45 : i32 to index
      %c0_20 = arith.constant 0 : index
      %47 = vector.load %arg3[%46, %c0_20] : memref<512x128xf32, #tpu.memory_space<vmem>>, vector<1x128xf32>
      %c0_i32_21 = arith.constant 0 : i32
      %48 = arith.addi %0, %c0_i32_21 : i32
      %c6_i32 = arith.constant 6 : i32
      %49 = arith.addi %48, %c6_i32 : i32
      %50 = arith.index_cast %49 : i32 to index
      %51 = memref.load %arg2[%50] : memref<128xi32, #tpu.memory_space<smem>>
      %52 = arith.index_cast %51 : i32 to index
      %c0_22 = arith.constant 0 : index
      %53 = vector.load %arg3[%52, %c0_22] : memref<512x128xf32, #tpu.memory_space<vmem>>, vector<1x128xf32>
      %c0_i32_23 = arith.constant 0 : i32
      %54 = arith.addi %0, %c0_i32_23 : i32
      %c7_i32 = arith.constant 7 : i32
      %55 = arith.addi %54, %c7_i32 : i32
      %56 = arith.index_cast %55 : i32 to index
      %57 = memref.load %arg2[%56] : memref<128xi32, #tpu.memory_space<smem>>
      %58 = arith.index_cast %57 : i32 to index
      %c0_24 = arith.constant 0 : index
      %59 = vector.load %arg3[%58, %c0_24] : memref<512x128xf32, #tpu.memory_space<vmem>>, vector<1x128xf32>
      %60 = tpu.concatenate %17, %23, %29, %35, %41, %47, %53, %59 in 0 : vector<1x128xf32>, vector<1x128xf32>, vector<1x128xf32>, vector<1x128xf32>, vector<1x128xf32>, vector<1x128xf32>, vector<1x128xf32>, vector<1x128xf32> -> vector<8x128xf32>
      %c0_25 = arith.constant 0 : index
      %c0_26 = arith.constant 0 : index
      %61 = vector.load %arg7[%c0_25, %c0_26] : memref<64x128xf32, #tpu.memory_space<vmem>>, vector<8x128xf32>
      tpu.vector_store %arg7[%c0_25, %c0_26], %60 {strides = array<i32>} : memref<64x128xf32, #tpu.memory_space<vmem>>, vector<8x128xf32>,
      %c8_i32 = arith.constant 8 : i32
      %62 = arith.addi %0, %c8_i32 : i32
      %c0_i32_27 = arith.constant 0 : i32
      %63 = arith.addi %62, %c0_i32_27 : i32
      %64 = arith.index_cast %63 : i32 to index
      %65 = memref.load %arg2[%64] : memref<128xi32, #tpu.memory_space<smem>>
      %66 = arith.index_cast %65 : i32 to index
      %c0_28 = arith.constant 0 : index
      %67 = vector.load %arg3[%66, %c0_28] : memref<512x128xf32, #tpu.memory_space<vmem>>, vector<1x128xf32>
      %c8_i32_29 = arith.constant 8 : i32
      %68 = arith.addi %0, %c8_i32_29 : i32
      %c1_i32_30 = arith.constant 1 : i32
      %69 = arith.addi %68, %c1_i32_30 : i32
      %70 = arith.index_cast %69 : i32 to index
      %71 = memref.load %arg2[%70] : memref<128xi32, #tpu.memory_space<smem>>
      %72 = arith.index_cast %71 : i32 to index
      %c0_31 = arith.constant 0 : index
      %73 = vector.load %arg3[%72, %c0_31] : memref<512x128xf32, #tpu.memory_space<vmem>>, vector<1x128xf32>
      %c8_i32_32 = arith.constant 8 : i32
      %74 = arith.addi %0, %c8_i32_32 : i32
      %c2_i32_33 = arith.constant 2 : i32
      %75 = arith.addi %74, %c2_i32_33 : i32
      %76 = arith.index_cast %75 : i32 to index
      %77 = memref.load %arg2[%76] : memref<128xi32, #tpu.memory_space<smem>>
      %78 = arith.index_cast %77 : i32 to index
      %c0_34 = arith.constant 0 : index
      %79 = vector.load %arg3[%78, %c0_34] : memref<512x128xf32, #tpu.memory_space<vmem>>, vector<1x128xf32>
      %c8_i32_35 = arith.constant 8 : i32
      %80 = arith.addi %0, %c8_i32_35 : i32
      %c3_i32_36 = arith.constant 3 : i32
      %81 = arith.addi %80, %c3_i32_36 : i32
      %82 = arith.index_cast %81 : i32 to index
      %83 = memref.load %arg2[%82] : memref<128xi32, #tpu.memory_space<smem>>
      %84 = arith.index_cast %83 : i32 to index
      %c0_37 = arith.constant 0 : index
      %85 = vector.load %arg3[%84, %c0_37] : memref<512x128xf32, #tpu.memory_space<vmem>>, vector<1x128xf32>
      %c8_i32_38 = arith.constant 8 : i32
      %86 = arith.addi %0, %c8_i32_38 : i32
      %c4_i32_39 = arith.constant 4 : i32
      %87 = arith.addi %86, %c4_i32_39 : i32
      %88 = arith.index_cast %87 : i32 to index
      %89 = memref.load %arg2[%88] : memref<128xi32, #tpu.memory_space<smem>>
      %90 = arith.index_cast %89 : i32 to index
      %c0_40 = arith.constant 0 : index
      %91 = vector.load %arg3[%90, %c0_40] : memref<512x128xf32, #tpu.memory_space<vmem>>, vector<1x128xf32>
      %c8_i32_41 = arith.constant 8 : i32
      %92 = arith.addi %0, %c8_i32_41 : i32
      %c5_i32_42 = arith.constant 5 : i32
      %93 = arith.addi %92, %c5_i32_42 : i32
      %94 = arith.index_cast %93 : i32 to index
      %95 = memref.load %arg2[%94] : memref<128xi32, #tpu.memory_space<smem>>
      %96 = arith.index_cast %95 : i32 to index
      %c0_43 = arith.constant 0 : index
      %97 = vector.load %arg3[%96, %c0_43] : memref<512x128xf32, #tpu.memory_space<vmem>>, vector<1x128xf32>
      %c8_i32_44 = arith.constant 8 : i32
      %98 = arith.addi %0, %c8_i32_44 : i32
      %c6_i32_45 = arith.constant 6 : i32
      %99 = arith.addi %98, %c6_i32_45 : i32
      %100 = arith.index_cast %99 : i32 to index
      %101 = memref.load %arg2[%100] : memref<128xi32, #tpu.memory_space<smem>>
      %102 = arith.index_cast %101 : i32 to index
      %c0_46 = arith.constant 0 : index
      %103 = vector.load %arg3[%102, %c0_46] : memref<512x128xf32, #tpu.memory_space<vmem>>, vector<1x128xf32>
      %c8_i32_47 = arith.constant 8 : i32
      %104 = arith.addi %0, %c8_i32_47 : i32
      %c7_i32_48 = arith.constant 7 : i32
      %105 = arith.addi %104, %c7_i32_48 : i32
      %106 = arith.index_cast %105 : i32 to index
      %107 = memref.load %arg2[%106] : memref<128xi32, #tpu.memory_space<smem>>
      %108 = arith.index_cast %107 : i32 to index
      %c0_49 = arith.constant 0 : index
      %109 = vector.load %arg3[%108, %c0_49] : memref<512x128xf32, #tpu.memory_space<vmem>>, vector<1x128xf32>
      %110 = tpu.concatenate %67, %73, %79, %85, %91, %97, %103, %109 in 0 : vector<1x128xf32>, vector<1x128xf32>, vector<1x128xf32>, vector<1x128xf32>, vector<1x128xf32>, vector<1x128xf32>, vector<1x128xf32>, vector<1x128xf32> -> vector<8x128xf32>
      %c8 = arith.constant 8 : index
      %c0_50 = arith.constant 0 : index
      %111 = vector.load %arg7[%c8, %c0_50] : memref<64x128xf32, #tpu.memory_space<vmem>>, vector<8x128xf32>
      tpu.vector_store %arg7[%c8, %c0_50], %110 {strides = array<i32>} : memref<64x128xf32, #tpu.memory_space<vmem>>, vector<8x128xf32>,
      %c16_i32 = arith.constant 16 : i32
      %112 = arith.addi %0, %c16_i32 : i32
      %c0_i32_51 = arith.constant 0 : i32
      %113 = arith.addi %112, %c0_i32_51 : i32
      %114 = arith.index_cast %113 : i32 to index
      %115 = memref.load %arg2[%114] : memref<128xi32, #tpu.memory_space<smem>>
      %116 = arith.index_cast %115 : i32 to index
      %c0_52 = arith.constant 0 : index
      %117 = vector.load %arg3[%116, %c0_52] : memref<512x128xf32, #tpu.memory_space<vmem>>, vector<1x128xf32>
      %c16_i32_53 = arith.constant 16 : i32
      %118 = arith.addi %0, %c16_i32_53 : i32
      %c1_i32_54 = arith.constant 1 : i32
      %119 = arith.addi %118, %c1_i32_54 : i32
      %120 = arith.index_cast %119 : i32 to index
      %121 = memref.load %arg2[%120] : memref<128xi32, #tpu.memory_space<smem>>
      %122 = arith.index_cast %121 : i32 to index
      %c0_55 = arith.constant 0 : index
      %123 = vector.load %arg3[%122, %c0_55] : memref<512x128xf32, #tpu.memory_space<vmem>>, vector<1x128xf32>
      %c16_i32_56 = arith.constant 16 : i32
      %124 = arith.addi %0, %c16_i32_56 : i32
      %c2_i32_57 = arith.constant 2 : i32
      %125 = arith.addi %124, %c2_i32_57 : i32
      %126 = arith.index_cast %125 : i32 to index
      %127 = memref.load %arg2[%126] : memref<128xi32, #tpu.memory_space<smem>>
      %128 = arith.index_cast %127 : i32 to index
      %c0_58 = arith.constant 0 : index
      %129 = vector.load %arg3[%128, %c0_58] : memref<512x128xf32, #tpu.memory_space<vmem>>, vector<1x128xf32>
      %c16_i32_59 = arith.constant 16 : i32
      %130 = arith.addi %0, %c16_i32_59 : i32
      %c3_i32_60 = arith.constant 3 : i32
      %131 = arith.addi %130, %c3_i32_60 : i32
      %132 = arith.index_cast %131 : i32 to index
      %133 = memref.load %arg2[%132] : memref<128xi32, #tpu.memory_space<smem>>
      %134 = arith.index_cast %133 : i32 to index
      %c0_61 = arith.constant 0 : index
      %135 = vector.load %arg3[%134, %c0_61] : memref<512x128xf32, #tpu.memory_space<vmem>>, vector<1x128xf32>
      %c16_i32_62 = arith.constant 16 : i32
      %136 = arith.addi %0, %c16_i32_62 : i32
      %c4_i32_63 = arith.constant 4 : i32
      %137 = arith.addi %136, %c4_i32_63 : i32
      %138 = arith.index_cast %137 : i32 to index
      %139 = memref.load %arg2[%138] : memref<128xi32, #tpu.memory_space<smem>>
      %140 = arith.index_cast %139 : i32 to index
      %c0_64 = arith.constant 0 : index
      %141 = vector.load %arg3[%140, %c0_64] : memref<512x128xf32, #tpu.memory_space<vmem>>, vector<1x128xf32>
      %c16_i32_65 = arith.constant 16 : i32
      %142 = arith.addi %0, %c16_i32_65 : i32
      %c5_i32_66 = arith.constant 5 : i32
      %143 = arith.addi %142, %c5_i32_66 : i32
      %144 = arith.index_cast %143 : i32 to index
      %145 = memref.load %arg2[%144] : memref<128xi32, #tpu.memory_space<smem>>
      %146 = arith.index_cast %145 : i32 to index
      %c0_67 = arith.constant 0 : index
      %147 = vector.load %arg3[%146, %c0_67] : memref<512x128xf32, #tpu.memory_space<vmem>>, vector<1x128xf32>
      %c16_i32_68 = arith.constant 16 : i32
      %148 = arith.addi %0, %c16_i32_68 : i32
      %c6_i32_69 = arith.constant 6 : i32
      %149 = arith.addi %148, %c6_i32_69 : i32
      %150 = arith.index_cast %149 : i32 to index
      %151 = memref.load %arg2[%150] : memref<128xi32, #tpu.memory_space<smem>>
      %152 = arith.index_cast %151 : i32 to index
      %c0_70 = arith.constant 0 : index
      %153 = vector.load %arg3[%152, %c0_70] : memref<512x128xf32, #tpu.memory_space<vmem>>, vector<1x128xf32>
      %c16_i32_71 = arith.constant 16 : i32
      %154 = arith.addi %0, %c16_i32_71 : i32
      %c7_i32_72 = arith.constant 7 : i32
      %155 = arith.addi %154, %c7_i32_72 : i32
      %156 = arith.index_cast %155 : i32 to index
      %157 = memref.load %arg2[%156] : memref<128xi32, #tpu.memory_space<smem>>
      %158 = arith.index_cast %157 : i32 to index
      %c0_73 = arith.constant 0 : index
      %159 = vector.load %arg3[%158, %c0_73] : memref<512x128xf32, #tpu.memory_space<vmem>>, vector<1x128xf32>
      %160 = tpu.concatenate %117, %123, %129, %135, %141, %147, %153, %159 in 0 : vector<1x128xf32>, vector<1x128xf32>, vector<1x128xf32>, vector<1x128xf32>, vector<1x128xf32>, vector<1x128xf32>, vector<1x128xf32>, vector<1x128xf32> -> vector<8x128xf32>
      %c16 = arith.constant 16 : index
      %c0_74 = arith.constant 0 : index
      %161 = vector.load %arg7[%c16, %c0_74] : memref<64x128xf32, #tpu.memory_space<vmem>>, vector<8x128xf32>
      tpu.vector_store %arg7[%c16, %c0_74], %160 {strides = array<i32>} : memref<64x128xf32, #tpu.memory_space<vmem>>, vector<8x128xf32>,
      %c24_i32 = arith.constant 24 : i32
      %162 = arith.addi %0, %c24_i32 : i32
      %c0_i32_75 = arith.constant 0 : i32
      %163 = arith.addi %162, %c0_i32_75 : i32
      %164 = arith.index_cast %163 : i32 to index
      %165 = memref.load %arg2[%164] : memref<128xi32, #tpu.memory_space<smem>>
      %166 = arith.index_cast %165 : i32 to index
      %c0_76 = arith.constant 0 : index
      %167 = vector.load %arg3[%166, %c0_76] : memref<512x128xf32, #tpu.memory_space<vmem>>, vector<1x128xf32>
      %c24_i32_77 = arith.constant 24 : i32
      %168 = arith.addi %0, %c24_i32_77 : i32
      %c1_i32_78 = arith.constant 1 : i32
      %169 = arith.addi %168, %c1_i32_78 : i32
      %170 = arith.index_cast %169 : i32 to index
      %171 = memref.load %arg2[%170] : memref<128xi32, #tpu.memory_space<smem>>
      %172 = arith.index_cast %171 : i32 to index
      %c0_79 = arith.constant 0 : index
      %173 = vector.load %arg3[%172, %c0_79] : memref<512x128xf32, #tpu.memory_space<vmem>>, vector<1x128xf32>
      %c24_i32_80 = arith.constant 24 : i32
      %174 = arith.addi %0, %c24_i32_80 : i32
      %c2_i32_81 = arith.constant 2 : i32
      %175 = arith.addi %174, %c2_i32_81 : i32
      %176 = arith.index_cast %175 : i32 to index
      %177 = memref.load %arg2[%176] : memref<128xi32, #tpu.memory_space<smem>>
      %178 = arith.index_cast %177 : i32 to index
      %c0_82 = arith.constant 0 : index
      %179 = vector.load %arg3[%178, %c0_82] : memref<512x128xf32, #tpu.memory_space<vmem>>, vector<1x128xf32>
      %c24_i32_83 = arith.constant 24 : i32
      %180 = arith.addi %0, %c24_i32_83 : i32
      %c3_i32_84 = arith.constant 3 : i32
      %181 = arith.addi %180, %c3_i32_84 : i32
      %182 = arith.index_cast %181 : i32 to index
      %183 = memref.load %arg2[%182] : memref<128xi32, #tpu.memory_space<smem>>
      %184 = arith.index_cast %183 : i32 to index
      %c0_85 = arith.constant 0 : index
      %185 = vector.load %arg3[%184, %c0_85] : memref<512x128xf32, #tpu.memory_space<vmem>>, vector<1x128xf32>
      %c24_i32_86 = arith.constant 24 : i32
      %186 = arith.addi %0, %c24_i32_86 : i32
      %c4_i32_87 = arith.constant 4 : i32
      %187 = arith.addi %186, %c4_i32_87 : i32
      %188 = arith.index_cast %187 : i32 to index
      %189 = memref.load %arg2[%188] : memref<128xi32, #tpu.memory_space<smem>>
      %190 = arith.index_cast %189 : i32 to index
      %c0_88 = arith.constant 0 : index
      %191 = vector.load %arg3[%190, %c0_88] : memref<512x128xf32, #tpu.memory_space<vmem>>, vector<1x128xf32>
      %c24_i32_89 = arith.constant 24 : i32
      %192 = arith.addi %0, %c24_i32_89 : i32
      %c5_i32_90 = arith.constant 5 : i32
      %193 = arith.addi %192, %c5_i32_90 : i32
      %194 = arith.index_cast %193 : i32 to index
      %195 = memref.load %arg2[%194] : memref<128xi32, #tpu.memory_space<smem>>
      %196 = arith.index_cast %195 : i32 to index
      %c0_91 = arith.constant 0 : index
      %197 = vector.load %arg3[%196, %c0_91] : memref<512x128xf32, #tpu.memory_space<vmem>>, vector<1x128xf32>
      %c24_i32_92 = arith.constant 24 : i32
      %198 = arith.addi %0, %c24_i32_92 : i32
      %c6_i32_93 = arith.constant 6 : i32
      %199 = arith.addi %198, %c6_i32_93 : i32
      %200 = arith.index_cast %199 : i32 to index
      %201 = memref.load %arg2[%200] : memref<128xi32, #tpu.memory_space<smem>>
      %202 = arith.index_cast %201 : i32 to index
      %c0_94 = arith.constant 0 : index
      %203 = vector.load %arg3[%202, %c0_94] : memref<512x128xf32, #tpu.memory_space<vmem>>, vector<1x128xf32>
      %c24_i32_95 = arith.constant 24 : i32
      %204 = arith.addi %0, %c24_i32_95 : i32
      %c7_i32_96 = arith.constant 7 : i32
      %205 = arith.addi %204, %c7_i32_96 : i32
      %206 = arith.index_cast %205 : i32 to index
      %207 = memref.load %arg2[%206] : memref<128xi32, #tpu.memory_space<smem>>
      %208 = arith.index_cast %207 : i32 to index
      %c0_97 = arith.constant 0 : index
      %209 = vector.load %arg3[%208, %c0_97] : memref<512x128xf32, #tpu.memory_space<vmem>>, vector<1x128xf32>
      %210 = tpu.concatenate %167, %173, %179, %185, %191, %197, %203, %209 in 0 : vector<1x128xf32>, vector<1x128xf32>, vector<1x128xf32>, vector<1x128xf32>, vector<1x128xf32>, vector<1x128xf32>, vector<1x128xf32>, vector<1x128xf32> -> vector<8x128xf32>
      %c24 = arith.constant 24 : index
      %c0_98 = arith.constant 0 : index
      %211 = vector.load %arg7[%c24, %c0_98] : memref<64x128xf32, #tpu.memory_space<vmem>>, vector<8x128xf32>
      tpu.vector_store %arg7[%c24, %c0_98], %210 {strides = array<i32>} : memref<64x128xf32, #tpu.memory_space<vmem>>, vector<8x128xf32>,
      %c32_i32 = arith.constant 32 : i32
      %212 = arith.addi %0, %c32_i32 : i32
      %c0_i32_99 = arith.constant 0 : i32
      %213 = arith.addi %212, %c0_i32_99 : i32
      %214 = arith.index_cast %213 : i32 to index
      %215 = memref.load %arg2[%214] : memref<128xi32, #tpu.memory_space<smem>>
      %216 = arith.index_cast %215 : i32 to index
      %c0_100 = arith.constant 0 : index
      %217 = vector.load %arg3[%216, %c0_100] : memref<512x128xf32, #tpu.memory_space<vmem>>, vector<1x128xf32>
      %c32_i32_101 = arith.constant 32 : i32
      %218 = arith.addi %0, %c32_i32_101 : i32
      %c1_i32_102 = arith.constant 1 : i32
      %219 = arith.addi %218, %c1_i32_102 : i32
      %220 = arith.index_cast %219 : i32 to index
      %221 = memref.load %arg2[%220] : memref<128xi32, #tpu.memory_space<smem>>
      %222 = arith.index_cast %221 : i32 to index
      %c0_103 = arith.constant 0 : index
      %223 = vector.load %arg3[%222, %c0_103] : memref<512x128xf32, #tpu.memory_space<vmem>>, vector<1x128xf32>
      %c32_i32_104 = arith.constant 32 : i32
      %224 = arith.addi %0, %c32_i32_104 : i32
      %c2_i32_105 = arith.constant 2 : i32
      %225 = arith.addi %224, %c2_i32_105 : i32
      %226 = arith.index_cast %225 : i32 to index
      %227 = memref.load %arg2[%226] : memref<128xi32, #tpu.memory_space<smem>>
      %228 = arith.index_cast %227 : i32 to index
      %c0_106 = arith.constant 0 : index
      %229 = vector.load %arg3[%228, %c0_106] : memref<512x128xf32, #tpu.memory_space<vmem>>, vector<1x128xf32>
      %c32_i32_107 = arith.constant 32 : i32
      %230 = arith.addi %0, %c32_i32_107 : i32
      %c3_i32_108 = arith.constant 3 : i32
      %231 = arith.addi %230, %c3_i32_108 : i32
      %232 = arith.index_cast %231 : i32 to index
      %233 = memref.load %arg2[%232] : memref<128xi32, #tpu.memory_space<smem>>
      %234 = arith.index_cast %233 : i32 to index
      %c0_109 = arith.constant 0 : index
      %235 = vector.load %arg3[%234, %c0_109] : memref<512x128xf32, #tpu.memory_space<vmem>>, vector<1x128xf32>
      %c32_i32_110 = arith.constant 32 : i32
      %236 = arith.addi %0, %c32_i32_110 : i32
      %c4_i32_111 = arith.constant 4 : i32
      %237 = arith.addi %236, %c4_i32_111 : i32
      %238 = arith.index_cast %237 : i32 to index
      %239 = memref.load %arg2[%238] : memref<128xi32, #tpu.memory_space<smem>>
      %240 = arith.index_cast %239 : i32 to index
      %c0_112 = arith.constant 0 : index
      %241 = vector.load %arg3[%240, %c0_112] : memref<512x128xf32, #tpu.memory_space<vmem>>, vector<1x128xf32>
      %c32_i32_113 = arith.constant 32 : i32
      %242 = arith.addi %0, %c32_i32_113 : i32
      %c5_i32_114 = arith.constant 5 : i32
      %243 = arith.addi %242, %c5_i32_114 : i32
      %244 = arith.index_cast %243 : i32 to index
      %245 = memref.load %arg2[%244] : memref<128xi32, #tpu.memory_space<smem>>
      %246 = arith.index_cast %245 : i32 to index
      %c0_115 = arith.constant 0 : index
      %247 = vector.load %arg3[%246, %c0_115] : memref<512x128xf32, #tpu.memory_space<vmem>>, vector<1x128xf32>
      %c32_i32_116 = arith.constant 32 : i32
      %248 = arith.addi %0, %c32_i32_116 : i32
      %c6_i32_117 = arith.constant 6 : i32
      %249 = arith.addi %248, %c6_i32_117 : i32
      %250 = arith.index_cast %249 : i32 to index
      %251 = memref.load %arg2[%250] : memref<128xi32, #tpu.memory_space<smem>>
      %252 = arith.index_cast %251 : i32 to index
      %c0_118 = arith.constant 0 : index
      %253 = vector.load %arg3[%252, %c0_118] : memref<512x128xf32, #tpu.memory_space<vmem>>, vector<1x128xf32>
      %c32_i32_119 = arith.constant 32 : i32
      %254 = arith.addi %0, %c32_i32_119 : i32
      %c7_i32_120 = arith.constant 7 : i32
      %255 = arith.addi %254, %c7_i32_120 : i32
      %256 = arith.index_cast %255 : i32 to index
      %257 = memref.load %arg2[%256] : memref<128xi32, #tpu.memory_space<smem>>
      %258 = arith.index_cast %257 : i32 to index
      %c0_121 = arith.constant 0 : index
      %259 = vector.load %arg3[%258, %c0_121] : memref<512x128xf32, #tpu.memory_space<vmem>>, vector<1x128xf32>
      %260 = tpu.concatenate %217, %223, %229, %235, %241, %247, %253, %259 in 0 : vector<1x128xf32>, vector<1x128xf32>, vector<1x128xf32>, vector<1x128xf32>, vector<1x128xf32>, vector<1x128xf32>, vector<1x128xf32>, vector<1x128xf32> -> vector<8x128xf32>
      %c32 = arith.constant 32 : index
      %c0_122 = arith.constant 0 : index
      %261 = vector.load %arg7[%c32, %c0_122] : memref<64x128xf32, #tpu.memory_space<vmem>>, vector<8x128xf32>
      tpu.vector_store %arg7[%c32, %c0_122], %260 {strides = array<i32>} : memref<64x128xf32, #tpu.memory_space<vmem>>, vector<8x128xf32>,
      %c40_i32 = arith.constant 40 : i32
      %262 = arith.addi %0, %c40_i32 : i32
      %c0_i32_123 = arith.constant 0 : i32
      %263 = arith.addi %262, %c0_i32_123 : i32
      %264 = arith.index_cast %263 : i32 to index
      %265 = memref.load %arg2[%264] : memref<128xi32, #tpu.memory_space<smem>>
      %266 = arith.index_cast %265 : i32 to index
      %c0_124 = arith.constant 0 : index
      %267 = vector.load %arg3[%266, %c0_124] : memref<512x128xf32, #tpu.memory_space<vmem>>, vector<1x128xf32>
      %c40_i32_125 = arith.constant 40 : i32
      %268 = arith.addi %0, %c40_i32_125 : i32
      %c1_i32_126 = arith.constant 1 : i32
      %269 = arith.addi %268, %c1_i32_126 : i32
      %270 = arith.index_cast %269 : i32 to index
      %271 = memref.load %arg2[%270] : memref<128xi32, #tpu.memory_space<smem>>
      %272 = arith.index_cast %271 : i32 to index
      %c0_127 = arith.constant 0 : index
      %273 = vector.load %arg3[%272, %c0_127] : memref<512x128xf32, #tpu.memory_space<vmem>>, vector<1x128xf32>
      %c40_i32_128 = arith.constant 40 : i32
      %274 = arith.addi %0, %c40_i32_128 : i32
      %c2_i32_129 = arith.constant 2 : i32
      %275 = arith.addi %274, %c2_i32_129 : i32
      %276 = arith.index_cast %275 : i32 to index
      %277 = memref.load %arg2[%276] : memref<128xi32, #tpu.memory_space<smem>>
      %278 = arith.index_cast %277 : i32 to index
      %c0_130 = arith.constant 0 : index
      %279 = vector.load %arg3[%278, %c0_130] : memref<512x128xf32, #tpu.memory_space<vmem>>, vector<1x128xf32>
      %c40_i32_131 = arith.constant 40 : i32
      %280 = arith.addi %0, %c40_i32_131 : i32
      %c3_i32_132 = arith.constant 3 : i32
      %281 = arith.addi %280, %c3_i32_132 : i32
      %282 = arith.index_cast %281 : i32 to index
      %283 = memref.load %arg2[%282] : memref<128xi32, #tpu.memory_space<smem>>
      %284 = arith.index_cast %283 : i32 to index
      %c0_133 = arith.constant 0 : index
      %285 = vector.load %arg3[%284, %c0_133] : memref<512x128xf32, #tpu.memory_space<vmem>>, vector<1x128xf32>
      %c40_i32_134 = arith.constant 40 : i32
      %286 = arith.addi %0, %c40_i32_134 : i32
      %c4_i32_135 = arith.constant 4 : i32
      %287 = arith.addi %286, %c4_i32_135 : i32
      %288 = arith.index_cast %287 : i32 to index
      %289 = memref.load %arg2[%288] : memref<128xi32, #tpu.memory_space<smem>>
      %290 = arith.index_cast %289 : i32 to index
      %c0_136 = arith.constant 0 : index
      %291 = vector.load %arg3[%290, %c0_136] : memref<512x128xf32, #tpu.memory_space<vmem>>, vector<1x128xf32>
      %c40_i32_137 = arith.constant 40 : i32
      %292 = arith.addi %0, %c40_i32_137 : i32
      %c5_i32_138 = arith.constant 5 : i32
      %293 = arith.addi %292, %c5_i32_138 : i32
      %294 = arith.index_cast %293 : i32 to index
      %295 = memref.load %arg2[%294] : memref<128xi32, #tpu.memory_space<smem>>
      %296 = arith.index_cast %295 : i32 to index
      %c0_139 = arith.constant 0 : index
      %297 = vector.load %arg3[%296, %c0_139] : memref<512x128xf32, #tpu.memory_space<vmem>>, vector<1x128xf32>
      %c40_i32_140 = arith.constant 40 : i32
      %298 = arith.addi %0, %c40_i32_140 : i32
      %c6_i32_141 = arith.constant 6 : i32
      %299 = arith.addi %298, %c6_i32_141 : i32
      %300 = arith.index_cast %299 : i32 to index
      %301 = memref.load %arg2[%300] : memref<128xi32, #tpu.memory_space<smem>>
      %302 = arith.index_cast %301 : i32 to index
      %c0_142 = arith.constant 0 : index
      %303 = vector.load %arg3[%302, %c0_142] : memref<512x128xf32, #tpu.memory_space<vmem>>, vector<1x128xf32>
      %c40_i32_143 = arith.constant 40 : i32
      %304 = arith.addi %0, %c40_i32_143 : i32
      %c7_i32_144 = arith.constant 7 : i32
      %305 = arith.addi %304, %c7_i32_144 : i32
      %306 = arith.index_cast %305 : i32 to index
      %307 = memref.load %arg2[%306] : memref<128xi32, #tpu.memory_space<smem>>
      %308 = arith.index_cast %307 : i32 to index
      %c0_145 = arith.constant 0 : index
      %309 = vector.load %arg3[%308, %c0_145] : memref<512x128xf32, #tpu.memory_space<vmem>>, vector<1x128xf32>
      %310 = tpu.concatenate %267, %273, %279, %285, %291, %297, %303, %309 in 0 : vector<1x128xf32>, vector<1x128xf32>, vector<1x128xf32>, vector<1x128xf32>, vector<1x128xf32>, vector<1x128xf32>, vector<1x128xf32>, vector<1x128xf32> -> vector<8x128xf32>
      %c40 = arith.constant 40 : index
      %c0_146 = arith.constant 0 : index
      %311 = vector.load %arg7[%c40, %c0_146] : memref<64x128xf32, #tpu.memory_space<vmem>>, vector<8x128xf32>
      tpu.vector_store %arg7[%c40, %c0_146], %310 {strides = array<i32>} : memref<64x128xf32, #tpu.memory_space<vmem>>, vector<8x128xf32>,
      %c48_i32 = arith.constant 48 : i32
      %312 = arith.addi %0, %c48_i32 : i32
      %c0_i32_147 = arith.constant 0 : i32
      %313 = arith.addi %312, %c0_i32_147 : i32
      %314 = arith.index_cast %313 : i32 to index
      %315 = memref.load %arg2[%314] : memref<128xi32, #tpu.memory_space<smem>>
      %316 = arith.index_cast %315 : i32 to index
      %c0_148 = arith.constant 0 : index
      %317 = vector.load %arg3[%316, %c0_148] : memref<512x128xf32, #tpu.memory_space<vmem>>, vector<1x128xf32>
      %c48_i32_149 = arith.constant 48 : i32
      %318 = arith.addi %0, %c48_i32_149 : i32
      %c1_i32_150 = arith.constant 1 : i32
      %319 = arith.addi %318, %c1_i32_150 : i32
      %320 = arith.index_cast %319 : i32 to index
      %321 = memref.load %arg2[%320] : memref<128xi32, #tpu.memory_space<smem>>
      %322 = arith.index_cast %321 : i32 to index
      %c0_151 = arith.constant 0 : index
      %323 = vector.load %arg3[%322, %c0_151] : memref<512x128xf32, #tpu.memory_space<vmem>>, vector<1x128xf32>
      %c48_i32_152 = arith.constant 48 : i32
      %324 = arith.addi %0, %c48_i32_152 : i32
      %c2_i32_153 = arith.constant 2 : i32
      %325 = arith.addi %324, %c2_i32_153 : i32
      %326 = arith.index_cast %325 : i32 to index
      %327 = memref.load %arg2[%326] : memref<128xi32, #tpu.memory_space<smem>>
      %328 = arith.index_cast %327 : i32 to index
      %c0_154 = arith.constant 0 : index
      %329 = vector.load %arg3[%328, %c0_154] : memref<512x128xf32, #tpu.memory_space<vmem>>, vector<1x128xf32>
      %c48_i32_155 = arith.constant 48 : i32
      %330 = arith.addi %0, %c48_i32_155 : i32
      %c3_i32_156 = arith.constant 3 : i32
      %331 = arith.addi %330, %c3_i32_156 : i32
      %332 = arith.index_cast %331 : i32 to index
      %333 = memref.load %arg2[%332] : memref<128xi32, #tpu.memory_space<smem>>
      %334 = arith.index_cast %333 : i32 to index
      %c0_157 = arith.constant 0 : index
      %335 = vector.load %arg3[%334, %c0_157] : memref<512x128xf32, #tpu.memory_space<vmem>>, vector<1x128xf32>
      %c48_i32_158 = arith.constant 48 : i32
      %336 = arith.addi %0, %c48_i32_158 : i32
      %c4_i32_159 = arith.constant 4 : i32
      %337 = arith.addi %336, %c4_i32_159 : i32
      %338 = arith.index_cast %337 : i32 to index
      %339 = memref.load %arg2[%338] : memref<128xi32, #tpu.memory_space<smem>>
      %340 = arith.index_cast %339 : i32 to index
      %c0_160 = arith.constant 0 : index
      %341 = vector.load %arg3[%340, %c0_160] : memref<512x128xf32, #tpu.memory_space<vmem>>, vector<1x128xf32>
      %c48_i32_161 = arith.constant 48 : i32
      %342 = arith.addi %0, %c48_i32_161 : i32
      %c5_i32_162 = arith.constant 5 : i32
      %343 = arith.addi %342, %c5_i32_162 : i32
      %344 = arith.index_cast %343 : i32 to index
      %345 = memref.load %arg2[%344] : memref<128xi32, #tpu.memory_space<smem>>
      %346 = arith.index_cast %345 : i32 to index
      %c0_163 = arith.constant 0 : index
      %347 = vector.load %arg3[%346, %c0_163] : memref<512x128xf32, #tpu.memory_space<vmem>>, vector<1x128xf32>
      %c48_i32_164 = arith.constant 48 : i32
      %348 = arith.addi %0, %c48_i32_164 : i32
      %c6_i32_165 = arith.constant 6 : i32
      %349 = arith.addi %348, %c6_i32_165 : i32
      %350 = arith.index_cast %349 : i32 to index
      %351 = memref.load %arg2[%350] : memref<128xi32, #tpu.memory_space<smem>>
      %352 = arith.index_cast %351 : i32 to index
      %c0_166 = arith.constant 0 : index
      %353 = vector.load %arg3[%352, %c0_166] : memref<512x128xf32, #tpu.memory_space<vmem>>, vector<1x128xf32>
      %c48_i32_167 = arith.constant 48 : i32
      %354 = arith.addi %0, %c48_i32_167 : i32
      %c7_i32_168 = arith.constant 7 : i32
      %355 = arith.addi %354, %c7_i32_168 : i32
      %356 = arith.index_cast %355 : i32 to index
      %357 = memref.load %arg2[%356] : memref<128xi32, #tpu.memory_space<smem>>
      %358 = arith.index_cast %357 : i32 to index
      %c0_169 = arith.constant 0 : index
      %359 = vector.load %arg3[%358, %c0_169] : memref<512x128xf32, #tpu.memory_space<vmem>>, vector<1x128xf32>
      %360 = tpu.concatenate %317, %323, %329, %335, %341, %347, %353, %359 in 0 : vector<1x128xf32>, vector<1x128xf32>, vector<1x128xf32>, vector<1x128xf32>, vector<1x128xf32>, vector<1x128xf32>, vector<1x128xf32>, vector<1x128xf32> -> vector<8x128xf32>
      %c48 = arith.constant 48 : index
      %c0_170 = arith.constant 0 : index
      %361 = vector.load %arg7[%c48, %c0_170] : memref<64x128xf32, #tpu.memory_space<vmem>>, vector<8x128xf32>
      tpu.vector_store %arg7[%c48, %c0_170], %360 {strides = array<i32>} : memref<64x128xf32, #tpu.memory_space<vmem>>, vector<8x128xf32>,
      %c56_i32 = arith.constant 56 : i32
      %362 = arith.addi %0, %c56_i32 : i32
      %c0_i32_171 = arith.constant 0 : i32
      %363 = arith.addi %362, %c0_i32_171 : i32
      %364 = arith.index_cast %363 : i32 to index
      %365 = memref.load %arg2[%364] : memref<128xi32, #tpu.memory_space<smem>>
      %366 = arith.index_cast %365 : i32 to index
      %c0_172 = arith.constant 0 : index
      %367 = vector.load %arg3[%366, %c0_172] : memref<512x128xf32, #tpu.memory_space<vmem>>, vector<1x128xf32>
      %c56_i32_173 = arith.constant 56 : i32
      %368 = arith.addi %0, %c56_i32_173 : i32
      %c1_i32_174 = arith.constant 1 : i32
      %369 = arith.addi %368, %c1_i32_174 : i32
      %370 = arith.index_cast %369 : i32 to index
      %371 = memref.load %arg2[%370] : memref<128xi32, #tpu.memory_space<smem>>
      %372 = arith.index_cast %371 : i32 to index
      %c0_175 = arith.constant 0 : index
      %373 = vector.load %arg3[%372, %c0_175] : memref<512x128xf32, #tpu.memory_space<vmem>>, vector<1x128xf32>
      %c56_i32_176 = arith.constant 56 : i32
      %374 = arith.addi %0, %c56_i32_176 : i32
      %c2_i32_177 = arith.constant 2 : i32
      %375 = arith.addi %374, %c2_i32_177 : i32
      %376 = arith.index_cast %375 : i32 to index
      %377 = memref.load %arg2[%376] : memref<128xi32, #tpu.memory_space<smem>>
      %378 = arith.index_cast %377 : i32 to index
      %c0_178 = arith.constant 0 : index
      %379 = vector.load %arg3[%378, %c0_178] : memref<512x128xf32, #tpu.memory_space<vmem>>, vector<1x128xf32>
      %c56_i32_179 = arith.constant 56 : i32
      %380 = arith.addi %0, %c56_i32_179 : i32
      %c3_i32_180 = arith.constant 3 : i32
      %381 = arith.addi %380, %c3_i32_180 : i32
      %382 = arith.index_cast %381 : i32 to index
      %383 = memref.load %arg2[%382] : memref<128xi32, #tpu.memory_space<smem>>
      %384 = arith.index_cast %383 : i32 to index
      %c0_181 = arith.constant 0 : index
      %385 = vector.load %arg3[%384, %c0_181] : memref<512x128xf32, #tpu.memory_space<vmem>>, vector<1x128xf32>
      %c56_i32_182 = arith.constant 56 : i32
      %386 = arith.addi %0, %c56_i32_182 : i32
      %c4_i32_183 = arith.constant 4 : i32
      %387 = arith.addi %386, %c4_i32_183 : i32
      %388 = arith.index_cast %387 : i32 to index
      %389 = memref.load %arg2[%388] : memref<128xi32, #tpu.memory_space<smem>>
      %390 = arith.index_cast %389 : i32 to index
      %c0_184 = arith.constant 0 : index
      %391 = vector.load %arg3[%390, %c0_184] : memref<512x128xf32, #tpu.memory_space<vmem>>, vector<1x128xf32>
      %c56_i32_185 = arith.constant 56 : i32
      %392 = arith.addi %0, %c56_i32_185 : i32
      %c5_i32_186 = arith.constant 5 : i32
      %393 = arith.addi %392, %c5_i32_186 : i32
      %394 = arith.index_cast %393 : i32 to index
      %395 = memref.load %arg2[%394] : memref<128xi32, #tpu.memory_space<smem>>
      %396 = arith.index_cast %395 : i32 to index
      %c0_187 = arith.constant 0 : index
      %397 = vector.load %arg3[%396, %c0_187] : memref<512x128xf32, #tpu.memory_space<vmem>>, vector<1x128xf32>
      %c56_i32_188 = arith.constant 56 : i32
      %398 = arith.addi %0, %c56_i32_188 : i32
      %c6_i32_189 = arith.constant 6 : i32
      %399 = arith.addi %398, %c6_i32_189 : i32
      %400 = arith.index_cast %399 : i32 to index
      %401 = memref.load %arg2[%400] : memref<128xi32, #tpu.memory_space<smem>>
      %402 = arith.index_cast %401 : i32 to index
      %c0_190 = arith.constant 0 : index
      %403 = vector.load %arg3[%402, %c0_190] : memref<512x128xf32, #tpu.memory_space<vmem>>, vector<1x128xf32>
      %c56_i32_191 = arith.constant 56 : i32
      %404 = arith.addi %0, %c56_i32_191 : i32
      %c7_i32_192 = arith.constant 7 : i32
      %405 = arith.addi %404, %c7_i32_192 : i32
      %406 = arith.index_cast %405 : i32 to index
      %407 = memref.load %arg2[%406] : memref<128xi32, #tpu.memory_space<smem>>
      %408 = arith.index_cast %407 : i32 to index
      %c0_193 = arith.constant 0 : index
      %409 = vector.load %arg3[%408, %c0_193] : memref<512x128xf32, #tpu.memory_space<vmem>>, vector<1x128xf32>
      %410 = tpu.concatenate %367, %373, %379, %385, %391, %397, %403, %409 in 0 : vector<1x128xf32>, vector<1x128xf32>, vector<1x128xf32>, vector<1x128xf32>, vector<1x128xf32>, vector<1x128xf32>, vector<1x128xf32>, vector<1x128xf32> -> vector<8x128xf32>
      %c56 = arith.constant 56 : index
      %c0_194 = arith.constant 0 : index
      %411 = vector.load %arg7[%c56, %c0_194] : memref<64x128xf32, #tpu.memory_space<vmem>>, vector<8x128xf32>
      tpu.vector_store %arg7[%c56, %c0_194], %410 {strides = array<i32>} : memref<64x128xf32, #tpu.memory_space<vmem>>, vector<8x128xf32>,
    } else {
    }
    %c0 = arith.constant 0 : index
    %c0_1 = arith.constant 0 : index
    %4 = vector.load %arg7[%c0, %c0_1] : memref<64x128xf32, #tpu.memory_space<vmem>>, vector<64x128xf32>
    %5 = arith.truncf %4 : vector<64x128xf32> to vector<64x128xbf16>
    %c0_2 = arith.constant 0 : index
    %c0_3 = arith.constant 0 : index
    %6 = vector.load %arg4[%c0_2, %c0_3] : memref<128x256xbf16, #tpu.memory_space<vmem>>, vector<128x256xbf16>
    %cst = arith.constant dense<0.000000e+00> : vector<64x256xf32>
    %7 = tpu.matmul %5, %6, %cst {dimension_numbers = #tpu.dot_dimension_numbers<[1], [0], [0], [1], [0, 0, 1, 1], [], []>} : vector<64x128xbf16>, vector<128x256xbf16>, vector<64x256xf32> -> vector<64x256xf32>
    %c0_4 = arith.constant 0 : index
    %c0_5 = arith.constant 0 : index
    %8 = vector.load %arg5[%c0_4, %c0_5] : memref<1x256xf32, #tpu.memory_space<vmem>>, vector<1x256xf32>
    %9 = vector.broadcast %8 : vector<1x256xf32> to vector<64x256xf32>
    %10 = arith.addf %7, %9 : vector<64x256xf32>
    %c0_6 = arith.constant 0 : index
    %c0_7 = arith.constant 0 : index
    %11 = vector.load %arg6[%c0_6, %c0_7] : memref<64x256xf32, #tpu.memory_space<vmem>>, vector<64x256xf32>
    tpu.vector_store %arg6[%c0_6, %c0_7], %10 {strides = array<i32>} : memref<64x256xf32, #tpu.memory_space<vmem>>, vector<64x256xf32>,
    return
  }
  func.func @transform_0(%arg0: i32, %arg1: i32, %arg2: memref<128xi32, #tpu.memory_space<smem>>) -> (i32, i32) {
    %c0_i32 = arith.constant 0 : i32
    %c0_i32_0 = arith.constant 0 : i32
    %c0_i32_1 = arith.constant 0 : i32
    return %c0_i32, %c0_i32_0 : i32, i32
  }
  func.func @transform_1(%arg0: i32, %arg1: i32, %arg2: memref<128xi32, #tpu.memory_space<smem>>) -> (i32, i32) {
    %c0_i32 = arith.constant 0 : i32
    %c0_i32_0 = arith.constant 0 : i32
    return %c0_i32, %arg1 : i32, i32
  }
  func.func @transform_2(%arg0: i32, %arg1: i32, %arg2: memref<128xi32, #tpu.memory_space<smem>>) -> (i32, i32) {
    %c0_i32 = arith.constant 0 : i32
    %c0_i32_0 = arith.constant 0 : i32
    return %c0_i32, %arg1 : i32, i32
  }
  func.func @transform_3(%arg0: i32, %arg1: i32, %arg2: memref<128xi32, #tpu.memory_space<smem>>) -> (i32, i32) {
    %c0_i32 = arith.constant 0 : i32
    return %arg0, %arg1 : i32, i32
  }
}

</mosaic_0001>

<bundles_post_ra>
// kernel: tpu_custom_call.1
= control target key start
LH: loop header
LB: loop body
LE: loop exit
PB: predicated region body
PF: predicated region fallthrough
CT: control target
= control target key end

     0   :  { %s2072_s0 = inlined_call_operand.hbm [shape: s32[128], index: 0, kind: input, shape index: {}]   ;;  %s2073_s1 = inlined_call_operand.hbm [shape: f32[512,128], index: 1, kind: input, shape index: {}]   ;;  %s2074_s2 = inlined_call_operand.hbm [shape: bf16[128,512], index: 2, kind: input, shape index: {}]   ;;  %s2075_s3 = inlined_call_operand.vmem [shape: f32[1,512], index: 3, kind: input, shape index: {}]   ;;  %s2076_s4 = inlined_call_operand.hbm [shape: f32[128,512], index: 4, kind: output, shape index: {}]  }
   0x1   :  { %2093 = sst [smem:[#allocation23_spill]] %s2073_s1  ;;  %s1344_s17 = scalar_lea.hbm %s2072_s0, 16 }
   0x2   :  { %2094 = sst [smem:[#allocation24_spill]] %s2074_s2  ;;  %p1345_p0 = scmp.ne.s32.totalorder %s2072_s0, %s1344_s17 }
   0x3   :  { %p1348_p1 = scmp.lt.u32.totalorder %s1344_s17, %s2072_s0 }
   0x5   :  { %p1350_p2 = pnand %p1348_p1, %p1345_p0 }
   0x7   :  { %1353 = shalt.err (!%p1350_p2)  }
   0x8   :  { %s1542_s22 = smov [#allocation4]  }
   0x9   :  { %10 = dma.hbm_to_smem %s2072_s0, 16, %s1542_s22, [#allocation3] }
   0xa   :  { %1484 = dma.done.wait [#allocation3], 16 }
   0xb   :  { %1485 = vsyncadd [#allocation3], 4294967280 }
   0xc   :  { %12 = sfence }
   0xd   :  { %13 = vsyncpa [#allocation6], 0 }
   0xe   :  { %14 = vsyncpa [#allocation9], 0 }
   0xf   :  { %16 = vsyncpa [#allocation9 + $0x1], 0 }
  0x10   :  { %17 = vsyncpa [#allocation7], 0 }
  0x11   :  { %19 = vsyncpa [#allocation7 + $0x1], 0  ;;  %s1590_s25 = smov 0   ;;  %s1592_s26 = smov 0  }
  0x12   :  { %s1594_s27 = smov 0   ;;  %s1596_s28 = smov 0  }
  0x13   :  { %s1598_s29 = smov 0   ;;  %s1600_s30 = smov 0  }
  0x14   :  { %s1602_s0 = smov 0   ;;  %s1604_s5 = smov 0  }
  0x15   :  { %s1606_s6 = smov 0   ;;  %s1608_s7 = smov 0  }
  0x16   :  { %s1610_s8 = smov 0  }
  0x17 LB: > { %2095 = sst [smem:[#allocation15_spill]] %s1500_s25  ;;  %s1143_s9 = sadd.s32 4294967295, %s1540_s8   ;;  %s1540_s8 = sphi %s1610_s8, %s25_s8   ;;  %s1536_s7 = sphi %s1608_s7, %s2132_s7   ;;  %s1532_s6 = sphi %s1606_s6, %s2131_s6   ;;  %s1528_s5 = sphi %s1604_s5, %s2130_s5   ;;  %s1524_s0 = sphi %s1602_s0, %s2129_s0   ;;  %s1520_s30 = sphi %s1600_s30, %s2128_s30   ;;  %s1516_s29 = sphi %s1598_s29, %s2137_s29   ;;  %s1512_s28 = sphi %s1596_s28, %s2136_s28   ;;  %s1508_s27 = sphi %s1594_s27, %s2135_s27   ;;  %s1504_s26 = sphi %s1592_s26, %s2134_s26   ;;  %s1500_s25 = sphi %s1590_s25, %s2133_s25  }
  0x18   : > { %2096 = sst [smem:[#allocation16_spill]] %s1520_s30  ;;  %s1144_s10 = sadd.s32 4294967294, %s1540_s8  }
  0x19   : > { %2097 = sst [smem:[#allocation17_spill]] %s1532_s6  ;;  %p72_p3 = scmp.ne.s32.totalorder %s1520_s30, %s1516_s29 }
  0x1a   : > { %2098 = sst [smem:[#allocation18_spill]] %s1536_s7  ;;  %p73_p4 = scmp.eq.s32.totalorder %s1540_s8, 0 }
  0x1b   : > { %p78_p5 = scmp.ne.s32.totalorder %s1516_s29, %s1512_s28  ;;  %p1650_p6 = scmp.eq.s32.totalorder %s1143_s9, 0 }
  0x1c   : > { %p1655_p7 = por %p73_p4, %p72_p3  ;;  %p129_p8 = scmp.ne.s32.totalorder %s1508_s27, %s1504_s26 }
  0x1d   : > { %s2099_s12 = scalar_select %p1650_p6, 1, 0 }
  0x1e   : > { %p1663_p9 = por %p1650_p6, %p78_p5  ;;  %p130_p10 = scmp.eq.s32.totalorder %s1143_s9, 3 }
  0x1f   : > { %p135_p11 = scmp.ne.s32.totalorder %s1504_s26, %s1500_s25  ;;  %p136_p12 = scmp.eq.s32.totalorder %s1144_s10, 3 }
  0x20   : > { %s2101_s15 = scalar_select %p1663_p9, 1, 0 }
  0x21   : > { %p1669_p13 = por %p130_p10, %p129_p8  ;;  %p1145_p0 = scmp.ge.s32.totalorder %s1540_s8, 1 }
  0x22   : > { %p1674_p1 = por %p136_p12, %p135_p11  ;;  %p143_p2 = scmp.lt.s32.totalorder %s1540_s8, 5 }
  0x23   : > { %s2102_s16 = scalar_select %p1669_p13, 1, 0 }
  0x24   : > { %s2103_s17 = scalar_select %p1674_p1, 1, 0 }
  0x25   : > { %p1679_p3 = pnand %p1145_p0, %p143_p2  ;;  %s1543_s19 = smov [#allocation5]  }
  0x26   : > { %2104 = sst [smem:[#allocation19_spill]] %s2103_s17  ;;  %s155_s20 = sshll.u32 %s1543_s19, 4  ;;  %s156_s20 = int_to_ptr.vmem [resolvable:$true] %s155_s20 }
  0x27   : > { %s2105_s18 = scalar_select %p1679_p3, 1, 0 }
  0x28   : > { %p1207_p4 = pneg %p1679_p3  ;;  %p1220_p5 = scmp.lt.s32.totalorder %s1540_s8, 4 }
  0x29   : > { %s2108_s1 = sld [smem:[#allocation23_spill]] }
  0x2a   : > { %p1688_p8 = pnand %p1207_p4, %p1650_p6  ;;  %p1694_p10 = pnand %p1220_p5, %p1655_p7 }
  0x2c   : > { %s2107_s22 = scalar_select %p1694_p10, 1, 0 }
  0x2d   : > { %p1356_p12 = pneg %p1688_p8 }
  0x2f   : > { %s1354_s28 = scalar_lea.hbm %s2108_s1, 8192 }
  0x30   : > { %p1355_p11 = scmp.ne.s32.totalorder %s2108_s1, %s1354_s28  ;;  %p1361_p4 = scmp.lt.u32.totalorder %s1354_s28, %s2108_s1 }
  0x32   : > { %p1357_p0 = pnand %p1356_p12, %p1355_p11 }
  0x34   : > { %p1358_p2 = pneg %p1357_p0 }
  0x36   : > { %p1363_p7 = pnand %p1361_p4, %p1358_p2 }
  0x38   : > { %1366 = shalt.err (!%p1363_p7)
}
  0x39   : > { %s1367_s14 = scalar_lea.vmem %s156_s20, 8192  ;;  %p1375_p9 = scmp.lt.s32.totalorder %s156_s20, %s156_s20 }
  0x3a   : > { %p1368_p5 = scmp.ne.s32.totalorder %s156_s20, %s1367_s14  ;;  %p1376_p6 = scmp.lt.s32.totalorder %s1367_s14, %s1367_s14 }
  0x3c   : > { %p1370_p1 = pnand %p1368_p5, %p1356_p12  ;;  %p1377_p3 = por %p1376_p6, %p1375_p9 }
  0x3e   : > { %p1371_p13 = pneg %p1370_p1 }
  0x40   : > { %p1378_p10 = pnand %p1377_p3, %p1371_p13 }
  0x42   : > { %1381 = shalt.err (!%p1378_p10)
}
  0x43   : > { %s2083_s23 = smov 128   ;;  %s2084_s13 = smov 8  }
  0x44   : > { %1210 = dma.hbm_to_vmem [thread:$0]  (!%p1688_p8), %s2108_s1, 8192, %s156_s20, [#allocation6], %s2083_s23, %s2083_s23, %s2084_s13  }
  0x45   : > { %s34_s9 = sadd.s32 1, %s1532_s6  ;;  %s37_s10 = sadd.s32 1, %s1536_s7 }
  0x46   : > { %p35_p6 = scmp.ge.s32.totalorder %s34_s9, 2  ;;  %s169_s19 = sand.u32 1, %s1520_s30  }
  0x47   : > { %s1148_s14 = sshll.u32 %s169_s19, 7  ;;  %s1181_s11 = sshll.u32 %s1532_s6, 7 }
  0x48   : > { %s2139_s9 = smov (%p35_p6, %s34_s9), 0  ;;  %s2141_s10 = smov (!%p35_p6, %s37_s10), %s1536_s7 }
  0x49   : > { %2109 = sst [smem:[#allocation20_spill]] %s2139_s9  ;;  %s62_s21 = ssub.s32 %s1532_s6, %s2139_s9 }
  0x4a   : > { %p39_p9 = scmp.ge.s32.totalorder %s2141_s10, 2  ;;  %p63_p13 = scmp.eq.s32.totalorder %s62_s21, 0 }
  0x4b   : > { %s173_s24 = scalar_lea.vmem [#allocation8], %s1148_s14  ;;  %s2111_s20 = sadd.s32 1, %s1520_s30 }
  0x4c   : > { %s180_s28 = sshll.u32 %s173_s24, 4  ;;  %s2143_s10 = smov (%p39_p9, %s2141_s10), 0  ;;  %s1742_s28 = int_to_ptr.vmem [resolvable:$true] %s180_s28 }
  0x4d   : > { %2110 = sst [smem:[#allocation21_spill]] %s2143_s10  ;;  %s114_s13 = ssub.s32 %s1536_s7, %s2143_s10 }
  0x4e   : > { %s1731_s23 = scalar_select %p63_p13, %s1520_s30, %s2111_s20  }
  0x4f   : > { %s2113_s2 = sld [smem:[#allocation24_spill]]  ;;  %s1740_s9 = sor.u32 %s114_s13, %s62_s21 }
  0x50   : > { %2112 = sst [smem:[#allocation22_spill]] %s1731_s23  ;;  %p117_p1 = scmp.eq.s32.totalorder %s1740_s9, 0 }
  0x51   : > { %s1745_s14 = scalar_lea.sflag [#allocation9], %s169_s19  ;;  %p2114_p8 = scmp.ne.s32.totalorder %s2107_s22, 0 }
  0x53   : > { %p1384_p10 = pneg %p2114_p8 }
  0x55   : > { %s1738_s25 = scalar_lea.hbm %s2113_s2, %s1181_s11  ;;  %s1387_s17 = scalar_lea.hbm %s2113_s2, 4096 }
  0x56   : > { %s1382_s24 = scalar_lea.hbm %s1738_s25, 2048  ;;  %p1388_p0 = scmp.lt.u32.totalorder %s1738_s25, %s2113_s2 }
  0x57   : > { %p1383_p3 = scmp.ne.s32.totalorder %s1738_s25, %s1382_s24  ;;  %p1389_p2 = scmp.lt.u32.totalorder %s1387_s17, %s1382_s24 }
  0x58   : > { %p1391_p7 = scmp.lt.u32.totalorder %s1382_s24, %s1738_s25 }
  0x59   : > { %p1385_p11 = pnand %p1384_p10, %p1383_p3  ;;  %p1390_p4 = por %p1389_p2, %p1388_p0 }
  0x5b   : > { %p1386_p12 = pneg %p1385_p11  ;;  %p1392_p5 = por %p1391_p7, %p1390_p4 }
  0x5d   : > { %p1393_p6 = pnand %p1392_p5, %p1386_p12 }
  0x5f   : > { %1396 = shalt.err (!%p1393_p6)
}
  0x60   : > { %s1397_s19 = scalar_lea.vmem %s1742_s28, 2048  ;;  %s1546_s20 = smov [#allocation8]  }
  0x61   : > { %p1398_p9 = scmp.ne.s32.totalorder %s1742_s28, %s1397_s19  ;;  %s1402_s1 = sshll.u32 %s1546_s20, 4  ;;  %s1403_s1 = int_to_ptr.vmem [resolvable:$false] %s1402_s1 }
  0x62   : > { %s1404_s11 = scalar_lea.vmem %s1403_s1, 4096  ;;  %p1405_p11 = scmp.lt.s32.totalorder %s1742_s28, %s1403_s1 }
  0x63   : > { %p1400_p13 = pnand %p1398_p9, %p1384_p10  ;;  %p1406_p0 = scmp.lt.s32.totalorder %s1404_s11, %s1397_s19 }
  0x65   : > { %p1401_p3 = pneg %p1400_p13  ;;  %p1407_p2 = por %p1406_p0, %p1405_p11 }
  0x67   : > { %p1408_p4 = pnand %p1407_p2, %p1401_p3 }
  0x69   : > { %1411 = shalt.err (!%p1408_p4)
}
  0x6a   : > { %s1547_s24 = smov 256   ;;  %s2115_s17 = smov 8  }
  0x6b   : > { %s2116_s13 = smov 128   ;;  %s2117_s21 = sadd.s32 1, %s1508_s27 }
  0x6c   : > { %1214 = dma.hbm_to_vmem [thread:$0]  (!%p2114_p8), %s1738_s25, 2048, %s1742_s28, %s1745_s14, %s1547_s24, %s2116_s13, %s2115_s17  }
  0x6d   : > { %s1780_s20 = scalar_select %p117_p1, %s1508_s27, %s2117_s21  }
  0x6e   : > { %p2118_p10 = scmp.ne.s32.totalorder %s2105_s18, 0 }
  0x6f   : > { %p2119_p12 = scmp.ne.s32.totalorder (!%p2118_p10), %s2099_s12, 0 }
  0x70   : > { %200 = sbr.rel (%p2118_p10) target bundleno = 509 (0x1fd), region = 32 }
  0x77   : > { %1487 = dma.done.wait (%p2119_p12), [#allocation6], 8192  }
  0x78   : > { %1489 = vsyncadd (%p2119_p12), [#allocation6], 4294959104  ;;  %s206_s22 = sand.u32 1, %s1516_s29   ;;  %p2120_p8 = scmp.ne.s32.totalorder %s2101_s15, 0 }
  0x79   : > { %s1153_s19 = sshll.u32 %s206_s22, 7  ;;  %s207_s1 = scalar_lea.sflag [#allocation9], %s206_s22 }
  0x7a   : > { %s1789_s11 = scalar_lea.vmem [#allocation8], %s1153_s19 }
  0x7b   : > { %1491 = dma.done.wait (%p2120_p8), %s207_s1, 2048  }
  0x7c   : > { %1493 = vsyncadd (%p2120_p8), %s207_s1, 4294965248  ;;  %s2088_s25 = sand.u32 1, %s1504_s26   ;;  %s1797_s18 = sshll.u32 %s1524_s0, 1 }
  0x7d   : > { %s1154_s12 = sshll.u32 %s2088_s25, 7  ;;  %p239_p1 = scmp.lt.s32.totalorder %s1797_s18, 3 }
  0x7e   : > { %s1803_s9 = sshll.u32 %s1528_s5, 6  ;;  %s1812_s17 = scalar_lea.vmem [#allocation10], %s1154_s12 }
  0x7f   : > { %s1806_s28 = scalar_select %p239_p1, %s1797_s18, 3 }
  0x80   : > { %p1157_p7 = scmp.ne.s32.totalorder %s1524_s0, 0 }
  0x81   : > { %s251_s13 = sld [smem:[#allocation4 + %s1803_s9]] (!%p1157_p7)  ;;  %s254_s21 = sadd.s32 (!%p1157_p7), 1, %s1803_s9  ;;  %vm303_vm0 = vcmask (!%p1157_p7), 1040384   ;;  %vm305_vm1 = vcmask (!%p1157_p7), 1041408   ;;  %vm307_vm2 = vcmask (!%p1157_p7), 1042432   ;;  %vm309_vm3 = vcmask (!%p1157_p7), 1043456  }
  0x82   : > { %250 = sbr.rel (%p1157_p7) target bundleno = 234 (0xea), region = 44  ;;  %s255_s22 = sld [smem:[#allocation4 + %s254_s21]] (!%p1157_p7)  ;;  %vm311_vm4 = vcmask (!%p1157_p7), 1044480   ;;  %vm313_vm5 = vcmask (!%p1157_p7), 1045504   ;;  %vm315_vm6 = vcmask (!%p1157_p7), 1046528  }
  0x83   : > { %s258_s19 = sadd.s32 (!%p1157_p7), 2, %s1803_s9  ;;  %s262_s14 = sadd.s32 (!%p1157_p7), 3, %s1803_s9 }
  0x84   : > { %s259_s1 = sld [smem:[#allocation4 + %s258_s19]] (!%p1157_p7)  ;;  %s266_s12 = sadd.s32 (!%p1157_p7), 4, %s1803_s9 }
  0x85   : > { %s263_s15 = sld [smem:[#allocation4 + %s262_s14]] (!%p1157_p7)  ;;  %s270_s0 = sadd.s32 (!%p1157_p7), 5, %s1803_s9 }
  0x86   : > { %s267_s25 = sld [smem:[#allocation4 + %s266_s12]] (!%p1157_p7)  ;;  %s274_s2 = sadd.s32 (!%p1157_p7), 6, %s1803_s9 }
  0x87   : > { %s271_s24 = sld [smem:[#allocation4 + %s270_s0]] (!%p1157_p7)  ;;  %s278_s7 = sadd.s32 (!%p1157_p7), 7, %s1803_s9 }
  0x88   : > { %s1822_s10 = sld [smem:[#allocation4 + %s274_s2]] (!%p1157_p7)  ;;  %s252_s6 = scalar_lea.vmem (!%p1157_p7), [#allocation5], %s251_s13 }
  0x89   : > { %v253_v0 = vld [vmem:[%s252_s6] sm:$0x1]  ;;  %s256_s23 = scalar_lea.vmem [#allocation5], %s255_s22  ;;  %s1825_s30 = sld [smem:[#allocation4 + %s278_s7]] }
  0x8a   : > { %v257_v1 = vld [vmem:[%s256_s23] sm:$0x1]  ;;  %s260_s21 = scalar_lea.vmem [#allocation5], %s259_s1  ;;  %s318_s19 = sadd.s32 8, %s1803_s9 }
  0x8b   : > { %v261_v2 = vld [vmem:[%s260_s21] sm:$0x1]  ;;  %v283_v3 = vrot.slane %v257_v1, 7  ;;  %s264_s14 = scalar_lea.vmem [#allocation5], %s263_s15  ;;  %s1828_s2 = sld [smem:[#allocation4 + %s318_s19]] }
  0x8c   : > { %v265_v4 = vld [vmem:[%s264_s14] sm:$0x1]  ;;  %v286_v5 = vrot.slane %v261_v2, 6  ;;  %s268_s12 = scalar_lea.vmem [#allocation5], %s267_s25  ;;  %s322_s6 = sadd.s32 9, %s1803_s9 }
  0x8d   : > { %v269_v6 = vld [vmem:[%s268_s12] sm:$0x1]  ;;  %v289_v7 = vrot.slane %v265_v4, 5  ;;  %v304_v8 = vsel %vm303_vm0, %v253_v0, %v283_v3  ;;  %s272_s7 = scalar_lea.vmem [#allocation5], %s271_s24  ;;  %s323_s23 = sld [smem:[#allocation4 + %s322_s6]] }
  0x8e   : > { %v273_v9 = vld [vmem:[%s272_s7] sm:$0x1]  ;;  %v292_v10 = vrot.slane %v269_v6, 4  ;;  %v306_v11 = vsel %vm305_vm1, %v304_v8, %v286_v5  ;;  %s276_s13 = scalar_lea.vmem [#allocation5], %s1822_s10  ;;  %s326_s25 = sadd.s32 10, %s1803_s9 }
  0x8f   : > { %v277_v12 = vld [vmem:[%s276_s13] sm:$0x1]  ;;  %v295_v13 = vrot.slane %v273_v9, 3  ;;  %v308_v14 = vsel %vm307_vm2, %v306_v11, %v289_v7  ;;  %s330_s22 = sadd.s32 11, %s1803_s9  ;;  %s327_s24 = sld [smem:[#allocation4 + %s326_s25]] }
  0x90   : > { %v298_v15 = vrot.slane %v277_v12, 2  ;;  %v310_v16 = vsel %vm309_vm3, %v308_v14, %v292_v10  ;;  %s280_s1 = scalar_lea.vmem [#allocation5], %s1825_s30  ;;  %s331_s10 = sld [smem:[#allocation4 + %s330_s22]] }
  0x91   : > { %v281_v17 = vld [vmem:[%s280_s1] sm:$0x1]  ;;  %v312_v18 = vsel %vm311_vm4, %v310_v16, %v295_v13  ;;  %s334_s15 = sadd.s32 12, %s1803_s9  ;;  %s338_s21 = sadd.s32 13, %s1803_s9 }
  0x92   : > { %v301_v19 = vrot.slane %v281_v17, 1  ;;  %v314_v20 = vsel %vm313_vm5, %v312_v18, %v298_v15  ;;  %s335_s0 = sld [smem:[#allocation4 + %s334_s15]]  ;;  %s342_s19 = sadd.s32 14, %s1803_s9 }
  0x93   : > { %s339_s14 = sld [smem:[#allocation4 + %s338_s21]]  ;;  %s320_s12 = scalar_lea.vmem [#allocation5], %s1828_s2 }
  0x94   : > { %v316_v21 = vsel %vm315_vm6, %v314_v20, %v301_v19  ;;  %v321_v22 = vld [vmem:[%s320_s12] sm:$0x1]  ;;  %s324_s30 = scalar_lea.vmem [#allocation5], %s323_s23  ;;  %s343_s6 = sld [smem:[#allocation4 + %s342_s19]] }
  0x95   : > { %317 = vst [vmem:[#allocation2] sm:$0xff] %v316_v21  ;;  %v325_v23 = vld [vmem:[%s324_s30] sm:$0x1]  ;;  %s346_s7 = sadd.s32 15, %s1803_s9  ;;  %s328_s25 = scalar_lea.vmem [#allocation5], %s327_s24 }
  0x96   : > { %s347_s13 = sld [smem:[#allocation4 + %s346_s7]]  ;;  %v351_v24 = vrot.slane %v325_v23, 7  ;;  %v329_v25 = vld [vmem:[%s328_s25] sm:$0x1]  ;;  %s379_s22 = sadd.s32 16, %s1803_s9 }
  0x97   : > { %s332_s1 = scalar_lea.vmem [#allocation5], %s331_s10  ;;  %v354_v27 = vrot.slane %v329_v25, 6  ;;  %s1849_s15 = sld [smem:[#allocation4 + %s379_s22]] }
  0x98   : > { %v333_v26 = vld [vmem:[%s332_s1] sm:$0x1]  ;;  %v371_v28 = vsel %vm303_vm0, %v321_v22, %v351_v24  ;;  %s336_s2 = scalar_lea.vmem [#allocation5], %s335_s0  ;;  %s383_s23 = sadd.s32 17, %s1803_s9 }
  0x99   : > { %v337_v29 = vld [vmem:[%s336_s2] sm:$0x1]  ;;  %v357_v30 = vrot.slane %v333_v26, 5  ;;  %s387_s21 = sadd.s32 18, %s1803_s9  ;;  %v372_v32 = vsel %vm305_vm1, %v371_v28, %v354_v27  ;;  %s384_s24 = sld [smem:[#allocation4 + %s383_s23]] }
  0x9a   : > { %v360_v31 = vrot.slane %v337_v29, 4  ;;  %s340_s19 = scalar_lea.vmem [#allocation5], %s339_s14  ;;  %s388_s10 = sld [smem:[#allocation4 + %s387_s21]] }
  0x9b   : > { %v341_v33 = vld [vmem:[%s340_s19] sm:$0x1]  ;;  %v373_v34 = vsel %vm307_vm2, %v372_v32, %v357_v30  ;;  %s344_s12 = scalar_lea.vmem [#allocation5], %s343_s6  ;;  %s391_s0 = sadd.s32 19, %s1803_s9 }
  0x9c   : > { %v345_v35 = vld [vmem:[%s344_s12] sm:$0x1]  ;;  %v363_v36 = vrot.slane %v341_v33, 3  ;;  %v374_v37 = vsel %vm309_vm3, %v373_v34, %v360_v31  ;;  %s348_s30 = scalar_lea.vmem [#allocation5], %s347_s13  ;;  %s392_s7 = sld [smem:[#allocation4 + %s391_s0]] }
  0x9d   : > { %v349_v38 = vld [vmem:[%s348_s30] sm:$0x1]  ;;  %v366_v39 = vrot.slane %v345_v35, 2  ;;  %s395_s25 = sadd.s32 20, %s1803_s9  ;;  %s399_s6 = sadd.s32 21, %s1803_s9 }
  0x9e   : > { %v369_v40 = vrot.slane %v349_v38, 1  ;;  %v375_v41 = vsel %vm311_vm4, %v374_v37, %v363_v36  ;;  %s396_s14 = sld [smem:[#allocation4 + %s395_s25]]  ;;  %s403_s22 = sadd.s32 22, %s1803_s9 }
  0x9f   : > { %v376_v42 = vsel %vm313_vm5, %v375_v41, %v366_v39  ;;  %s400_s1 = sld [smem:[#allocation4 + %s399_s6]]  ;;  %s381_s2 = scalar_lea.vmem [#allocation5], %s1849_s15 }
  0xa0   : > { %v377_v43 = vsel %vm315_vm6, %v376_v42, %v369_v40  ;;  %v382_v44 = vld [vmem:[%s381_s2] sm:$0x1]  ;;  %s385_s13 = scalar_lea.vmem [#allocation5], %s384_s24  ;;  %s404_s23 = sld [smem:[#allocation4 + %s403_s22]] }
  0xa1   : > { %378 = vst [vmem:[#allocation2 + $0x8] sm:$0xff] %v377_v43  ;;  %v386_v45 = vld [vmem:[%s385_s13] sm:$0x1]  ;;  %s389_s21 = scalar_lea.vmem [#allocation5], %s388_s10  ;;  %s407_s19 = sadd.s32 23, %s1803_s9 }
  0xa2   : > { %v390_v46 = vld [vmem:[%s389_s21] sm:$0x1]  ;;  %v412_v47 = vrot.slane %v386_v45, 7  ;;  %s440_s12 = sadd.s32 24, %s1803_s9  ;;  %s408_s0 = sld [smem:[#allocation4 + %s407_s19]] }
  0xa3   : > { %v415_v48 = vrot.slane %v390_v46, 6  ;;  %s393_s30 = scalar_lea.vmem [#allocation5], %s392_s7  ;;  %s1867_s25 = sld [smem:[#allocation4 + %s440_s12]] }
  0xa4   : > { %v394_v49 = vld [vmem:[%s393_s30] sm:$0x1]  ;;  %v432_v50 = vsel %vm303_vm0, %v382_v44, %v412_v47  ;;  %s397_s15 = scalar_lea.vmem [#allocation5], %s396_s14  ;;  %s444_s24 = sadd.s32 25, %s1803_s9 }
  0xa5   : > { %v398_v51 = vld [vmem:[%s397_s15] sm:$0x1]  ;;  %v418_v52 = vrot.slane %v394_v49, 5  ;;  %v433_v53 = vsel %vm305_vm1, %v432_v50, %v415_v48  ;;  %s448_s10 = sadd.s32 26, %s1803_s9  ;;  %s445_s6 = sld [smem:[#allocation4 + %s444_s24]] }
  0xa6   : > { %v421_v54 = vrot.slane %v398_v51, 4  ;;  %s401_s22 = scalar_lea.vmem [#allocation5], %s400_s1  ;;  %s449_s7 = sld [smem:[#allocation4 + %s448_s10]] }
  0xa7   : > { %v402_v55 = vld [vmem:[%s401_s22] sm:$0x1]  ;;  %v434_v56 = vsel %vm307_vm2, %v433_v53, %v418_v52  ;;  %s405_s2 = scalar_lea.vmem [#allocation5], %s404_s23  ;;  %s452_s14 = sadd.s32 27, %s1803_s9 }
  0xa8   : > { %v406_v57 = vld [vmem:[%s405_s2] sm:$0x1]  ;;  %v424_v58 = vrot.slane %v402_v55, 3  ;;  %v435_v59 = vsel %vm309_vm3, %v434_v56, %v421_v54  ;;  %s456_s13 = sadd.s32 28, %s1803_s9  ;;  %s453_s21 = sld [smem:[#allocation4 + %s452_s14]] }
  0xa9   : > { %v427_v60 = vrot.slane %v406_v57, 2  ;;  %s409_s19 = scalar_lea.vmem [#allocation5], %s408_s0  ;;  %s457_s1 = sld [smem:[#allocation4 + %s456_s13]] }
  0xaa   : > { %v410_v61 = vld [vmem:[%s409_s19] sm:$0x1]  ;;  %v436_v62 = vsel %vm311_vm4, %v435_v59, %v424_v58  ;;  %s460_s23 = sadd.s32 29, %s1803_s9  ;;  %s464_s12 = sadd.s32 30, %s1803_s9 }
  0xab   : > { %v430_v63 = vrot.slane %v410_v61, 1  ;;  %v437_v0 = vsel %vm313_vm5, %v436_v62, %v427_v60  ;;  %s461_s30 = sld [smem:[#allocation4 + %s460_s23]]  ;;  %s442_s15 = scalar_lea.vmem [#allocation5], %s1867_s25 }
  0xac   : > { %v443_v2 = vld [vmem:[%s442_s15] sm:$0x1]  ;;  %s446_s24 = scalar_lea.vmem [#allocation5], %s445_s6  ;;  %s465_s10 = sld [smem:[#allocation4 + %s464_s12]] }
  0xad   : > { %v438_v1 = vsel %vm315_vm6, %v437_v0, %v430_v63  ;;  %v447_v3 = vld [vmem:[%s446_s24] sm:$0x1]  ;;  %s450_s0 = scalar_lea.vmem [#allocation5], %s449_s7  ;;  %s468_s22 = sadd.s32 31, %s1803_s9 }
  0xae   : > { %439 = vst [vmem:[#allocation2 + $0x10] sm:$0xff] %v438_v1  ;;  %v451_v4 = vld [vmem:[%s450_s0] sm:$0x1]  ;;  %v473_v5 = vrot.slane %v447_v3, 7  ;;  %s501_s2 = sadd.s32 32, %s1803_s9  ;;  %s469_s14 = sld [smem:[#allocation4 + %s468_s22]] }
  0xaf   : > { %v476_v6 = vrot.slane %v451_v4, 6  ;;  %s454_s13 = scalar_lea.vmem [#allocation5], %s453_s21  ;;  %s1885_s19 = sld [smem:[#allocation4 + %s501_s2]] }
  0xb0   : > { %v455_v7 = vld [vmem:[%s454_s13] sm:$0x1]  ;;  %v493_v8 = vsel %vm303_vm0, %v443_v2, %v473_v5  ;;  %s458_s25 = scalar_lea.vmem [#allocation5], %s457_s1  ;;  %s505_s6 = sadd.s32 33, %s1803_s9 }
  0xb1   : > { %v459_v9 = vld [vmem:[%s458_s25] sm:$0x1]  ;;  %v479_v10 = vrot.slane %v455_v7, 5  ;;  %v494_v11 = vsel %vm305_vm1, %v493_v8, %v476_v6  ;;  %s509_s7 = sadd.s32 34, %s1803_s9  ;;  %s506_s23 = sld [smem:[#allocation4 + %s505_s6]] }
  0xb2   : > { %v482_v12 = vrot.slane %v459_v9, 4  ;;  %s462_s12 = scalar_lea.vmem [#allocation5], %s461_s30  ;;  %s510_s21 = sld [smem:[#allocation4 + %s509_s7]] }
  0xb3   : > { %v463_v13 = vld [vmem:[%s462_s12] sm:$0x1]  ;;  %v495_v14 = vsel %vm307_vm2, %v494_v11, %v479_v10  ;;  %s466_s15 = scalar_lea.vmem [#allocation5], %s465_s10  ;;  %s513_s1 = sadd.s32 35, %s1803_s9 }
  0xb4   : > { %v467_v15 = vld [vmem:[%s466_s15] sm:$0x1]  ;;  %v485_v16 = vrot.slane %v463_v13, 3  ;;  %v496_v17 = vsel %vm309_vm3, %v495_v14, %v482_v12  ;;  %s517_s24 = sadd.s32 36, %s1803_s9  ;;  %s514_s0 = sld [smem:[#allocation4 + %s513_s1]] }
  0xb5   : > { %v488_v18 = vrot.slane %v467_v15, 2  ;;  %s470_s22 = scalar_lea.vmem [#allocation5], %s469_s14  ;;  %s518_s30 = sld [smem:[#allocation4 + %s517_s24]] }
  0xb6   : > { %v471_v19 = vld [vmem:[%s470_s22] sm:$0x1]  ;;  %v497_v20 = vsel %vm311_vm4, %v496_v17, %v485_v16  ;;  %s521_s10 = sadd.s32 37, %s1803_s9  ;;  %s525_s2 = sadd.s32 38, %s1803_s9 }
  0xb7   : > { %v491_v21 = vrot.slane %v471_v19, 1  ;;  %v498_v22 = vsel %vm313_vm5, %v497_v20, %v488_v18  ;;  %s522_s13 = sld [smem:[#allocation4 + %s521_s10]]  ;;  %s503_s25 = scalar_lea.vmem [#allocation5], %s1885_s19 }
  0xb8   : > { %v504_v24 = vld [vmem:[%s503_s25] sm:$0x1]  ;;  %s507_s6 = scalar_lea.vmem [#allocation5], %s506_s23  ;;  %s526_s7 = sld [smem:[#allocation4 + %s525_s2]] }
  0xb9   : > { %v499_v23 = vsel %vm315_vm6, %v498_v22, %v491_v21  ;;  %v508_v25 = vld [vmem:[%s507_s6] sm:$0x1]  ;;  %s511_s14 = scalar_lea.vmem [#allocation5], %s510_s21  ;;  %s529_s12 = sadd.s32 39, %s1803_s9 }
  0xba   : > { %500 = vst [vmem:[#allocation2 + $0x18] sm:$0xff] %v499_v23  ;;  %v512_v26 = vld [vmem:[%s511_s14] sm:$0x1]  ;;  %v534_v27 = vrot.slane %v508_v25, 7  ;;  %s562_s15 = sadd.s32 40, %s1803_s9  ;;  %s530_s1 = sld [smem:[#allocation4 + %s529_s12]] }
  0xbb   : > { %v537_v28 = vrot.slane %v512_v26, 6  ;;  %s515_s24 = scalar_lea.vmem [#allocation5], %s514_s0  ;;  %s1903_s22 = sld [smem:[#allocation4 + %s562_s15]] }
  0xbc   : > { %v516_v29 = vld [vmem:[%s515_s24] sm:$0x1]  ;;  %v554_v30 = vsel %vm303_vm0, %v504_v24, %v534_v27  ;;  %s519_s19 = scalar_lea.vmem [#allocation5], %s518_s30  ;;  %s566_s23 = sadd.s32 41, %s1803_s9 }
  0xbd   : > { %v520_v31 = vld [vmem:[%s519_s19] sm:$0x1]  ;;  %v540_v32 = vrot.slane %v516_v29, 5  ;;  %v555_v33 = vsel %vm305_vm1, %v554_v30, %v537_v28  ;;  %s570_s21 = sadd.s32 42, %s1803_s9  ;;  %s567_s10 = sld [smem:[#allocation4 + %s566_s23]] }
  0xbe   : > { %v543_v34 = vrot.slane %v520_v31, 4  ;;  %s523_s2 = scalar_lea.vmem [#allocation5], %s522_s13  ;;  %s571_s0 = sld [smem:[#allocation4 + %s570_s21]] }
  0xbf   : > { %v524_v35 = vld [vmem:[%s523_s2] sm:$0x1]  ;;  %v556_v36 = vsel %vm307_vm2, %v555_v33, %v540_v32  ;;  %s527_s25 = scalar_lea.vmem [#allocation5], %s526_s7  ;;  %s574_s30 = sadd.s32 43, %s1803_s9 }
  0xc0   : > { %v528_v37 = vld [vmem:[%s527_s25] sm:$0x1]  ;;  %v546_v38 = vrot.slane %v524_v35, 3  ;;  %v557_v39 = vsel %vm309_vm3, %v556_v36, %v543_v34  ;;  %s578_s6 = sadd.s32 44, %s1803_s9  ;;  %s575_s14 = sld [smem:[#allocation4 + %s574_s30]] }
  0xc1   : > { %v549_v40 = vrot.slane %v528_v37, 2  ;;  %s531_s12 = scalar_lea.vmem [#allocation5], %s530_s1  ;;  %s579_s13 = sld [smem:[#allocation4 + %s578_s6]] }
  0xc2   : > { %v532_v41 = vld [vmem:[%s531_s12] sm:$0x1]  ;;  %v558_v42 = vsel %vm311_vm4, %v557_v39, %v546_v38  ;;  %s582_s7 = sadd.s32 45, %s1803_s9  ;;  %s586_s15 = sadd.s32 46, %s1803_s9 }
  0xc3   : > { %v552_v43 = vrot.slane %v532_v41, 1  ;;  %v559_v44 = vsel %vm313_vm5, %v558_v42, %v549_v40  ;;  %s583_s24 = sld [smem:[#allocation4 + %s582_s7]]  ;;  %s564_s19 = scalar_lea.vmem [#allocation5], %s1903_s22 }
  0xc4   : > { %v565_v46 = vld [vmem:[%s564_s19] sm:$0x1]  ;;  %s568_s23 = scalar_lea.vmem [#allocation5], %s567_s10  ;;  %s587_s21 = sld [smem:[#allocation4 + %s586_s15]] }
  0xc5   : > { %v560_v45 = vsel %vm315_vm6, %v559_v44, %v552_v43  ;;  %v569_v47 = vld [vmem:[%s568_s23] sm:$0x1]  ;;  %s572_s1 = scalar_lea.vmem [#allocation5], %s571_s0  ;;  %s590_s2 = sadd.s32 47, %s1803_s9 }
  0xc6   : > { %561 = vst [vmem:[#allocation2 + $0x20] sm:$0xff] %v560_v45  ;;  %v573_v48 = vld [vmem:[%s572_s1] sm:$0x1]  ;;  %v595_v49 = vrot.slane %v569_v47, 7  ;;  %s623_s25 = sadd.s32 48, %s1803_s9  ;;  %s591_s30 = sld [smem:[#allocation4 + %s590_s2]] }
  0xc7   : > { %v598_v50 = vrot.slane %v573_v48, 6  ;;  %s576_s6 = scalar_lea.vmem [#allocation5], %s575_s14  ;;  %s1921_s12 = sld [smem:[#allocation4 + %s623_s25]] }
  0xc8   : > { %v577_v51 = vld [vmem:[%s576_s6] sm:$0x1]  ;;  %v615_v52 = vsel %vm303_vm0, %v565_v46, %v595_v49  ;;  %s580_s22 = scalar_lea.vmem [#allocation5], %s579_s13  ;;  %s627_s10 = sadd.s32 49, %s1803_s9 }
  0xc9   : > { %v581_v53 = vld [vmem:[%s580_s22] sm:$0x1]  ;;  %v601_v54 = vrot.slane %v577_v51, 5  ;;  %v616_v55 = vsel %vm305_vm1, %v615_v52, %v598_v50  ;;  %s631_s0 = sadd.s32 50, %s1803_s9  ;;  %s628_s7 = sld [smem:[#allocation4 + %s627_s10]] }
  0xca   : > { %v604_v56 = vrot.slane %v581_v53, 4  ;;  %s584_s15 = scalar_lea.vmem [#allocation5], %s583_s24  ;;  %s632_s14 = sld [smem:[#allocation4 + %s631_s0]] }
  0xcb   : > { %v585_v57 = vld [vmem:[%s584_s15] sm:$0x1]  ;;  %v617_v58 = vsel %vm307_vm2, %v616_v55, %v601_v54  ;;  %s588_s19 = scalar_lea.vmem [#allocation5], %s587_s21  ;;  %s635_s13 = sadd.s32 51, %s1803_s9 }
  0xcc   : > { %v589_v59 = vld [vmem:[%s588_s19] sm:$0x1]  ;;  %v607_v60 = vrot.slane %v585_v57, 3  ;;  %v618_v61 = vsel %vm309_vm3, %v617_v58, %v604_v56  ;;  %s639_s23 = sadd.s32 52, %s1803_s9  ;;  %s636_s1 = sld [smem:[#allocation4 + %s635_s13]] }
  0xcd   : > { %v610_v62 = vrot.slane %v589_v59, 2  ;;  %s592_s2 = scalar_lea.vmem [#allocation5], %s591_s30  ;;  %s640_s24 = sld [smem:[#allocation4 + %s639_s23]] }
  0xce   : > { %v593_v63 = vld [vmem:[%s592_s2] sm:$0x1]  ;;  %v619_v0 = vsel %vm311_vm4, %v618_v61, %v607_v60  ;;  %s643_s21 = sadd.s32 53, %s1803_s9  ;;  %s647_s25 = sadd.s32 54, %s1803_s9 }
  0xcf   : > { %v613_v1 = vrot.slane %v593_v63, 1  ;;  %v620_v2 = vsel %vm313_vm5, %v619_v0, %v610_v62  ;;  %s644_s6 = sld [smem:[#allocation4 + %s643_s21]]  ;;  %s625_s22 = scalar_lea.vmem [#allocation5], %s1921_s12 }
  0xd0   : > { %v626_v4 = vld [vmem:[%s625_s22] sm:$0x1]  ;;  %s629_s10 = scalar_lea.vmem [#allocation5], %s628_s7  ;;  %s648_s0 = sld [smem:[#allocation4 + %s647_s25]] }
  0xd1   : > { %v621_v3 = vsel %vm315_vm6, %v620_v2, %v613_v1  ;;  %v630_v5 = vld [vmem:[%s629_s10] sm:$0x1]  ;;  %s633_s30 = scalar_lea.vmem [#allocation5], %s632_s14  ;;  %s651_s15 = sadd.s32 55, %s1803_s9 }
  0xd2   : > { %622 = vst [vmem:[#allocation2 + $0x28] sm:$0xff] %v621_v3  ;;  %v634_v6 = vld [vmem:[%s633_s30] sm:$0x1]  ;;  %v656_v7 = vrot.slane %v630_v5, 7  ;;  %s684_s19 = sadd.s32 56, %s1803_s9  ;;  %s652_s13 = sld [smem:[#allocation4 + %s651_s15]] }
  0xd3   : > { %v659_v8 = vrot.slane %v634_v6, 6  ;;  %s637_s23 = scalar_lea.vmem [#allocation5], %s636_s1  ;;  %s1939_s2 = sld [smem:[#allocation4 + %s684_s19]] }
  0xd4   : > { %v638_v9 = vld [vmem:[%s637_s23] sm:$0x1]  ;;  %v676_v10 = vsel %vm303_vm0, %v626_v4, %v656_v7  ;;  %s641_s12 = scalar_lea.vmem [#allocation5], %s640_s24  ;;  %s688_s7 = sadd.s32 57, %s1803_s9 }
  0xd5   : > { %v642_v11 = vld [vmem:[%s641_s12] sm:$0x1]  ;;  %v662_v12 = vrot.slane %v638_v9, 5  ;;  %v677_v13 = vsel %vm305_vm1, %v676_v10, %v659_v8  ;;  %s692_s14 = sadd.s32 58, %s1803_s9  ;;  %s689_s21 = sld [smem:[#allocation4 + %s688_s7]] }
  0xd6   : > { %v665_v14 = vrot.slane %v642_v11, 4  ;;  %s645_s25 = scalar_lea.vmem [#allocation5], %s644_s6  ;;  %s693_s1 = sld [smem:[#allocation4 + %s692_s14]] }
  0xd7   : > { %v646_v15 = vld [vmem:[%s645_s25] sm:$0x1]  ;;  %v678_v16 = vsel %vm307_vm2, %v677_v13, %v662_v12  ;;  %s649_s22 = scalar_lea.vmem [#allocation5], %s648_s0  ;;  %s696_s24 = sadd.s32 59, %s1803_s9 }
  0xd8   : > { %v650_v17 = vld [vmem:[%s649_s22] sm:$0x1]  ;;  %v668_v18 = vrot.slane %v646_v15, 3  ;;  %v679_v19 = vsel %vm309_vm3, %v678_v16, %v665_v14  ;;  %s700_s10 = sadd.s32 60, %s1803_s9  ;;  %s697_s30 = sld [smem:[#allocation4 + %s696_s24]] }
  0xd9   : > { %v671_v20 = vrot.slane %v650_v17, 2  ;;  %s653_s15 = scalar_lea.vmem [#allocation5], %s652_s13  ;;  %s701_s6 = sld [smem:[#allocation4 + %s700_s10]] }
  0xda   : > { %v654_v21 = vld [vmem:[%s653_s15] sm:$0x1]  ;;  %v680_v22 = vsel %vm311_vm4, %v679_v19, %v668_v18  ;;  %s704_s19 = sadd.s32 61, %s1803_s9  ;;  %s708_s0 = sadd.s32 62, %s1803_s9 }
  0xdb   : > { %v674_v23 = vrot.slane %v654_v21, 1  ;;  %v681_v24 = vsel %vm313_vm5, %v680_v22, %v671_v20  ;;  %s705_s23 = sld [smem:[#allocation4 + %s704_s19]]  ;;  %s686_s12 = scalar_lea.vmem [#allocation5], %s1939_s2 }
  0xdc   : > { %v687_v26 = vld [vmem:[%s686_s12] sm:$0x1]  ;;  %s690_s7 = scalar_lea.vmem [#allocation5], %s689_s21  ;;  %s709_s14 = sld [smem:[#allocation4 + %s708_s0]] }
  0xdd   : > { %v682_v25 = vsel %vm315_vm6, %v681_v24, %v674_v23  ;;  %v691_v27 = vld [vmem:[%s690_s7] sm:$0x1]  ;;  %s694_s13 = scalar_lea.vmem [#allocation5], %s693_s1  ;;  %s712_s25 = sadd.s32 63, %s1803_s9 }
  0xde   : > { %683 = vst [vmem:[#allocation2 + $0x30] sm:$0xff] %v682_v25  ;;  %v695_v28 = vld [vmem:[%s694_s13] sm:$0x1]  ;;  %v717_v29 = vrot.slane %v691_v27, 7  ;;  %s713_s22 = sld [smem:[#allocation4 + %s712_s25]]  ;;  %s698_s24 = scalar_lea.vmem [#allocation5], %s697_s30 }
  0xdf   : > { %v720_v30 = vrot.slane %v695_v28, 6  ;;  %v699_v31 = vld [vmem:[%s698_s24] sm:$0x1]  ;;  %s702_s10 = scalar_lea.vmem [#allocation5], %s701_s6 }
  0xe0   : > { %v737_v32 = vsel %vm303_vm0, %v687_v26, %v717_v29  ;;  %v703_v33 = vld [vmem:[%s702_s10] sm:$0x1]  ;;  %v723_v34 = vrot.slane %v699_v31, 5 }
  0xe1   : > { %v738_v35 = vsel %vm305_vm1, %v737_v32, %v720_v30  ;;  %v726_v36 = vrot.slane %v703_v33, 4  ;;  %s706_s2 = scalar_lea.vmem [#allocation5], %s705_s23 }
  0xe2   : > { %v707_v37 = vld [vmem:[%s706_s2] sm:$0x1]  ;;  %v739_v38 = vsel %vm307_vm2, %v738_v35, %v723_v34  ;;  %s710_s21 = scalar_lea.vmem [#allocation5], %s709_s14 }
  0xe3   : > { %v711_v39 = vld [vmem:[%s710_s21] sm:$0x1]  ;;  %v729_v40 = vrot.slane %v707_v37, 3  ;;  %v740_v41 = vsel %vm309_vm3, %v739_v38, %v726_v36 }
  0xe4   : > { %v732_v42 = vrot.slane %v711_v39, 2  ;;  %s714_s9 = scalar_lea.vmem [#allocation5], %s713_s22 }
  0xe5   : > { %v715_v43 = vld [vmem:[%s714_s9] sm:$0x1]  ;;  %v741_v44 = vsel %vm311_vm4, %v740_v41, %v729_v40 }
  0xe6   : > { %v735_v45 = vrot.slane %v715_v43, 1  ;;  %v742_v46 = vsel %vm313_vm5, %v741_v44, %v732_v42 }
  0xe8   : > { %v743_v47 = vsel %vm315_vm6, %v742_v46, %v735_v45 }
  0xe9   : > { %744 = vst [vmem:[#allocation2 + $0x38] sm:$0xff] %v743_v47 }
  0xea PF: > { %v1320_v48 = vld [vmem:[%s1789_s11 + $0x4] ss:$8 sps:$4 sm:$0xff]   ;;  %v1322_v49 = vld [vmem:[%s1789_s11] ss:$8 sps:$4 sm:$0xff]   ;;  %v1548_v50 = vmov 0   ;;  %v747_v7 = vld [vmem:[#allocation2 + $0x10] sm:$0xff]  ;;  %v775_v13 = vlaneseq  ;;  %s2121_s30 = scalar_lea.vmem %s2075_s3, %s1806_s28 }
  0xeb   : > { %897 = vmatprep.mubr.bf16.mxu0 %v1548_v50  ;;  %917 = vmatprep.mubr.bf16.mxu1 %v1548_v50  ;;  %v1323_v51 = vld [vmem:[%s1789_s11 + $0x14] ss:$8 sps:$4 sm:$0xff]   ;;  %v1325_v52 = vld [vmem:[%s1789_s11 + $0x10] ss:$8 sps:$4 sm:$0xff]   ;;  %v1326_v53 = vld [vmem:[%s1789_s11 + $0x24] ss:$8 sps:$4 sm:$0xff]  }
  0xec   : > { %865 = vmatprep.subr.bf16.mxu0 %v1320_v48  ;;  %1183 = vmatprep.subr.bf16.mxu1 %v1320_v48  ;;  %v1328_v54 = vld [vmem:[%s1789_s11 + $0x20] ss:$8 sps:$4 sm:$0xff]   ;;  %v1329_v55 = vld [vmem:[%s1789_s11 + $0x34] ss:$8 sps:$4 sm:$0xff]   ;;  %v1331_v56 = vld [vmem:[%s1789_s11 + $0x30] ss:$8 sps:$4 sm:$0xff]  }
  0xed   : > { %866 = vmatpush1.bf16.msra.mxu0 %v1322_v49  ;;  %1191 = vmatpush1.bf16.msra.mxu1 %v1322_v49  ;;  %v1332_v57 = vld [vmem:[%s1789_s11 + $0x44] ss:$8 sps:$4 sm:$0xff]   ;;  %v1334_v58 = vld [vmem:[%s1789_s11 + $0x40] ss:$8 sps:$4 sm:$0xff]   ;;  %v1335_v59 = vld [vmem:[%s1789_s11 + $0x54] ss:$8 sps:$4 sm:$0xff]  }
  0xee   : > { %867 = vmatprep.subr.bf16.mxu0 %v1323_v51  ;;  %1184 = vmatprep.subr.bf16.mxu1 %v1323_v51  ;;  %v1337_v60 = vld [vmem:[%s1789_s11 + $0x50] ss:$8 sps:$4 sm:$0xff]   ;;  %v1338_v61 = vld [vmem:[%s1789_s11 + $0x64] ss:$8 sps:$4 sm:$0xff]   ;;  %v1340_v62 = vld [vmem:[%s1789_s11 + $0x60] ss:$8 sps:$4 sm:$0xff]  }
  0xef   : > { %v1341_v63 = vld [vmem:[%s1789_s11 + $0x74] ss:$8 sps:$4 sm:$0xff]   ;;  %v1343_v0 = vld [vmem:[%s1789_s11 + $0x70] ss:$8 sps:$4 sm:$0xff]   ;;  %v745_v1 = vld [vmem:[#allocation2] sm:$0xff]  ;;  %v776_v14 = vshrl.u32 %v775_v13, 7 }
  0xf0   : > { %v746_v2 = vld [vmem:[#allocation2 + $0x8] sm:$0xff]  ;;  %v749_v3 = vld [vmem:[#allocation2 + $0x20] sm:$0xff]  ;;  %v748_v8 = vld [vmem:[#allocation2 + $0x18] sm:$0xff]  ;;  %s1182_s15 = sshll.u32 %s1528_s5, 5  ;;  %s971_s6 = sshll.u32 %s1812_s17, 4  ;;  %s2001_s6 = int_to_ptr.vmem [resolvable:$true] %s971_s6 }
  0xf1   : > { %868 = vmatpush1.bf16.msra.mxu0 %v1325_v52  ;;  %1192 = vmatpush1.bf16.msra.mxu1 %v1325_v52  ;;  %v750_v4 = vld [vmem:[#allocation2 + $0x28] sm:$0xff]  ;;  %v753_v5 = vpack.c.bf16 %v746_v2, %v745_v1  ;;  %v751_v9 = vld [vmem:[#allocation2 + $0x30] sm:$0xff]  ;;  %v752_v10 = vld [vmem:[#allocation2 + $0x38] sm:$0xff]  ;;  %v754_v11 = vpack.c.bf16 %v748_v8, %v747_v7  ;;  %v777_v15 = vsub.s32 0, %v776_v14  ;;  %v781_v17 = vsub.s32 1, %v776_v14  ;;  %s968_s5 = sadd.s32 %s1182_s15, %s1797_s18  ;;  %s2122_s23 = sand.u32 1, %s1504_s26  }
  0xf2   : > { %869 = vmatprep.subr.bf16.mxu0 %v1326_v53  ;;  %1185 = vmatprep.subr.bf16.mxu1 %v1326_v53  ;;  %v755_v6 = vpack.c.bf16 %v750_v4, %v749_v3  ;;  %v756_v12 = vpack.c.bf16 %v752_v10, %v751_v9  ;;  %v773_v16 = vld [vmem:[%s2121_s30] sm:$0x3]  ;;  %s1178_s28 = sshll.u32 %s968_s5, 7  ;;  %s2011_s12 = scalar_lea.sflag [#allocation7], %s2122_s23 }
  0xf3   : > { %v778_v18 = vrot.slane %v773_v16, %v777_v15  ;;  %v782_v19 = vrot.slane %v773_v16, %v781_v17  ;;  %s1997_s0 = scalar_lea.hbm %s2076_s4, %s1178_s28  ;;  %s1412_s7 = scalar_lea.vmem %s2001_s6, 2048 }
  0xf4   : > { %p1413_p5 = scmp.ne.s32.totalorder %s2001_s6, %s1412_s7  ;;  %p2123_p6 = scmp.ne.s32.totalorder %s2102_s16, 0 }
  0xf5   : > { %870 = vmatpush1.bf16.msra.mxu0 %v1328_v54  ;;  %1193 = vmatpush1.bf16.msra.mxu1 %v1328_v54  ;;  %s1549_s14 = smov [#allocation10]  }
  0xf6   : > { %871 = vmatprep.subr.bf16.mxu0 %v1329_v55  ;;  %1186 = vmatprep.subr.bf16.mxu1 %v1329_v55  ;;  %p1414_p9 = pnand %p1413_p5, %p2123_p6  ;;  %s1416_s13 = sshll.u32 %s1549_s14, 4  ;;  %s1417_s13 = int_to_ptr.vmem [resolvable:$false] %s1416_s13 }
  0xf7   : > { %s1418_s25 = scalar_lea.vmem %s1417_s13, 4096  ;;  %p1419_p3 = scmp.lt.s32.totalorder %s2001_s6, %s1417_s13 }
  0xf8   : > { %p1415_p13 = pneg %p1414_p9  ;;  %p1420_p11 = scmp.lt.s32.totalorder %s1418_s25, %s1412_s7 }
  0xf9   : > { %872 = vmatpush1.bf16.msra.mxu0 %v1331_v56  ;;  %1194 = vmatpush1.bf16.msra.mxu1 %v1331_v56 }
  0xfa   : > { %873 = vmatprep.subr.bf16.mxu0 %v1332_v57  ;;  %1187 = vmatprep.subr.bf16.mxu1 %v1332_v57  ;;  %p1421_p0 = por %p1420_p11, %p1419_p3 }
  0xfc   : > { %p1422_p2 = pnand %p1421_p0, %p1415_p13 }
  0xfd   : > { %874 = vmatpush1.bf16.msra.mxu0 %v1334_v58  ;;  %1195 = vmatpush1.bf16.msra.mxu1 %v1334_v58 }
  0xfe   : > { %875 = vmatprep.subr.bf16.mxu0 %v1335_v59  ;;  %1188 = vmatprep.subr.bf16.mxu1 %v1335_v59 }
 0x101   : > { %876 = vmatpush1.bf16.msra.mxu0 %v1337_v60  ;;  %1196 = vmatpush1.bf16.msra.mxu1 %v1337_v60 }
 0x102   : > { %877 = vmatprep.subr.bf16.mxu0 %v1338_v61  ;;  %1189 = vmatprep.subr.bf16.mxu1 %v1338_v61 }
 0x105   : > { %878 = vmatpush1.bf16.msra.mxu0 %v1340_v62  ;;  %1197 = vmatpush1.bf16.msra.mxu1 %v1340_v62 }
 0x106   : > { %879 = vmatprep.subr.bf16.mxu0 %v1341_v63  ;;  %1190 = vmatprep.subr.bf16.mxu1 %v1341_v63 }
 0x109   : > { %880 = vmatpush1.bf16.msra.mxu0 %v1343_v0  ;;  %1198 = vmatpush1.bf16.msra.mxu1 %v1343_v0 }
 0x10c   : > { %898 = vmatmul.mubr.bf16.vlgmr.msra.gmra.mrb[0].mxu0 %v753_v5  ;;  %918 = vmatmul.mubr.bf16.vlgmr.msra.gmra.mrb[0].mxu1 %v755_v6 }
 0x10d   : > { %907 = vmatprep.mubr.bf16.mxu0 %v1548_v50  ;;  %927 = vmatprep.mubr.bf16.mxu1 %v1548_v50 }
 0x114   : > { %908 = vmatmul.mubr.bf16.gmra.mrb[4].mxu0 %v754_v11  ;;  %928 = vmatmul.mubr.bf16.gmra.mrb[4].mxu1 %v756_v12 }
 0x1df   : > { %v899_v20 = vpop.f32.mrb[0].mxu0  ;;  %v919_v21 = vpop.f32.mrb[0].mxu1 }
 0x1e0   : > { %v900_v22 = vadd.f32 %v899_v20, %v778_v18  ;;  %v920_v23 = vadd.f32 %v919_v21, %v778_v18  ;;  %v901_v24 = vpop.f32.mrb[1].mxu0  ;;  %v921_v25 = vpop.f32.mrb[1].mxu1 }
 0x1e1   : > { %v902_v26 = vadd.f32 %v901_v24, %v782_v19  ;;  %v922_v27 = vadd.f32 %v921_v25, %v782_v19  ;;  %v903_v28 = vpop.f32.mrb[2].mxu0  ;;  %v923_v29 = vpop.f32.mrb[2].mxu1 }
 0x1e2   : > { %938 = vst [vmem:[%s1812_s17] sm:$0xff] %v900_v22  ;;  %946 = vst [vmem:[%s1812_s17 + $0x40] sm:$0xff] %v920_v23  ;;  %v904_v30 = vadd.f32 %v903_v28, %v778_v18  ;;  %v924_v31 = vadd.f32 %v923_v29, %v778_v18  ;;  %v905_v32 = vpop.f32.mrb[3].mxu0  ;;  %v925_v33 = vpop.f32.mrb[3].mxu1 }
 0x1e3   : > { %939 = vst [vmem:[%s1812_s17 + $0x8] sm:$0xff] %v902_v26  ;;  %947 = vst [vmem:[%s1812_s17 + $0x48] sm:$0xff] %v922_v27  ;;  %v906_v34 = vadd.f32 %v905_v32, %v782_v19  ;;  %v926_v35 = vadd.f32 %v925_v33, %v782_v19 }
 0x1e4   : > { %940 = vst [vmem:[%s1812_s17 + $0x10] sm:$0xff] %v904_v30  ;;  %948 = vst [vmem:[%s1812_s17 + $0x50] sm:$0xff] %v924_v31 }
 0x1e5   : > { %941 = vst [vmem:[%s1812_s17 + $0x18] sm:$0xff] %v906_v34  ;;  %949 = vst [vmem:[%s1812_s17 + $0x58] sm:$0xff] %v926_v35 }
 0x1e7   : > { %v909_v36 = vpop.f32.mrb[4].mxu0  ;;  %v929_v37 = vpop.f32.mrb[4].mxu1 }
 0x1e8   : > { %v910_v38 = vadd.f32 %v909_v36, %v778_v18  ;;  %v930_v39 = vadd.f32 %v929_v37, %v778_v18  ;;  %v911_v40 = vpop.f32.mrb[5].mxu0  ;;  %v931_v41 = vpop.f32.mrb[5].mxu1 }
 0x1e9   : > { %v912_v42 = vadd.f32 %v911_v40, %v782_v19  ;;  %v932_v43 = vadd.f32 %v931_v41, %v782_v19  ;;  %v913_v44 = vpop.f32.mrb[6].mxu0  ;;  %v933_v45 = vpop.f32.mrb[6].mxu1 }
 0x1ea   : > { %942 = vst [vmem:[%s1812_s17 + $0x20] sm:$0xff] %v910_v38  ;;  %950 = vst [vmem:[%s1812_s17 + $0x60] sm:$0xff] %v930_v39  ;;  %v914_v46 = vadd.f32 %v913_v44, %v778_v18  ;;  %v934_v47 = vadd.f32 %v933_v45, %v778_v18  ;;  %v915_v48 = vpop.f32.mrb[7].mxu0  ;;  %v935_v49 = vpop.f32.mrb[7].mxu1 }
 0x1eb   : > { %943 = vst [vmem:[%s1812_s17 + $0x28] sm:$0xff] %v912_v42  ;;  %951 = vst [vmem:[%s1812_s17 + $0x68] sm:$0xff] %v932_v43  ;;  %v916_v50 = vadd.f32 %v915_v48, %v782_v19  ;;  %v936_v51 = vadd.f32 %v935_v49, %v782_v19 }
 0x1ec   : > { %944 = vst [vmem:[%s1812_s17 + $0x30] sm:$0xff] %v914_v46  ;;  %952 = vst [vmem:[%s1812_s17 + $0x70] sm:$0xff] %v934_v47 }
 0x1ed   : > { %945 = vst [vmem:[%s1812_s17 + $0x38] sm:$0xff] %v916_v50  ;;  %953 = vst [vmem:[%s1812_s17 + $0x78] sm:$0xff] %v936_v51 }
 0x1ee   : > { %1425 = shalt.err (!%p1422_p2)
}
 0x1ef   : > { %s1426_s17 = scalar_lea.hbm %s1997_s0, 2048  ;;  %s1430_s10 = scalar_lea.hbm %s2076_s4, 8192 }
 0x1f0   : > { %p1427_p4 = scmp.ne.s32.totalorder %s1997_s0, %s1426_s17  ;;  %p1431_p8 = scmp.lt.u32.totalorder %s1997_s0, %s2076_s4 }
 0x1f1   : > { %p1432_p1 = scmp.lt.u32.totalorder %s1430_s10, %s1426_s17  ;;  %p1434_p5 = scmp.lt.u32.totalorder %s1426_s17, %s1997_s0 }
 0x1f2   : > { %p1428_p10 = pnand %p1427_p4, %p2123_p6 }
 0x1f3   : > { %p1433_p7 = por %p1432_p1, %p1431_p8 }
 0x1f4   : > { %p1429_p12 = pneg %p1428_p10 }
 0x1f5   : > { %p1435_p9 = por %p1434_p5, %p1433_p7 }
 0x1f7   : > { %p1436_p13 = pnand %p1435_p9, %p1429_p12 }
 0x1f9   : > { %1439 = shalt.err (!%p1436_p13)
}
 0x1fa   : > { %s1550_s9 = smov 256   ;;  %s1551_s11 = smov 512  }
 0x1fb   : > { %s1552_s1 = smov 16  }
 0x1fc   : > { %1205 = dma.vmem_to_hbm [thread:$0]  (%p2123_p6), %s2001_s6, 2048, %s1997_s0, %s2011_s12, %s1550_s9, %s1551_s11, %s1552_s1  }
 0x1fd PF: > { %s2124_s30 = sld [smem:[#allocation15_spill]]  ;;  %s2125_s15 = sld [smem:[#allocation19_spill]] }
 0x1fe   : > { %p1222_p3 = scmp.ge.s32.totalorder %s1540_s8, 2 }
 0x203   : > { %s986_s5 = sand.u32 1, %s2124_s30   ;;  %p2126_p11 = scmp.ne.s32.totalorder %s2125_s15, 0 }
 0x204   : > { %s987_s28 = scalar_lea.sflag [#allocation7], %s986_s5 }
 0x205   : > { %p1216_p0 = pnand %p1222_p3, %p2126_p11 }
 0x207   : > { %1495 = dma.done.wait (!%p1216_p0), %s987_s28, 2048  }
 0x208   : > { %1497 = vsyncadd (!%p1216_p0), %s987_s28, 4294965248  ;;  %s25_s8 = sadd.s32 1, %s1540_s8   ;;  %s2127_s16 = sld [smem:[#allocation16_spill]] }
 0x209   : > { %p22_p2 = scmp.ge.s32.totalorder %s25_s8, 6   ;;  %s2128_s30 = sld [smem:[#allocation22_spill]] }
 0x20a   : > { %s2129_s0 = sld [smem:[#allocation17_spill]]  ;;  %s2130_s5 = sld [smem:[#allocation18_spill]] }
 0x20b   : > { %s2131_s6 = sld [smem:[#allocation20_spill]]  ;;  %s2132_s7 = sld [smem:[#allocation21_spill]] }
 0x20c   : > { %s2133_s25 = smov %s1504_s26  ;;  %s2134_s26 = smov %s1508_s27 }
 0x20d   : > { %s2135_s27 = smov %s1780_s20  ;;  %s2136_s28 = smov %s1516_s29 }
 0x20e   : > { %s2137_s29 = smov %s2127_s16  ;;  %24 = sbr.rel (!%p22_p2) target bundleno = 23 (0x17), region = 153 }
 0x215   :  { %992 = vsyncpa [#allocation6], 1 }
 0x216   :  { %994 = vsyncpa [#allocation6 + $0x1], 1 }
 0x217   :  { %995 = vsyncpa [#allocation9], 1 }
 0x218   :  { %997 = vsyncpa [#allocation9 + $0x1], 1 }
 0x219   :  { %998 = vsyncpa [#allocation7], 1 }
 0x21a   :  { %1000 = vsyncpa [#allocation7 + $0x1], 1 }

</bundles_post_ra>
